<compile_context>
chip_gen: v6e
topology: v6e:2x2x1
jax: 0.10.0
libtpu: 0.0.40
codegen_flags: <defaults>
</compile_context>

<pallas_src>
import jax
import jax.numpy as jnp
from jax.experimental import pallas as pl
from jax.experimental.pallas import tpu as pltpu

LANE = 128                      # channel padding target (lane width)
ROW_TILE = 512                  # target rows per matmul grid step
K_TILE = 512                    # max contraction tile (v7x 64 MiB VMEM friendly)
VMEM_LIMIT = 48 * 1024 * 1024   # explicit scoped-VMEM budget (< v7x physical)


def _round_up(x, m):
    return (x + m - 1) // m * m


def _pad_last(x, n):
    pad = n - x.shape[-1]
    if pad == 0:
        return x
    return jnp.pad(x, [(0, 0)] * (x.ndim - 1) + [(0, pad)])


def _choose_row_tile(m):
    """Row tile: multiple of 8, <= ROW_TILE, and >= 2 grid steps when possible
    (megacore sharding + pipelining; never a single (M, K) block)."""
    m8 = _round_up(m, 8)
    tm = min(ROW_TILE, m8)
    if m8 >= 16 and m8 // tm < 2:
        tm = _round_up((m8 + 1) // 2, 8)
    return tm, _round_up(m, tm)


def _choose_k_tile(k):
    if k <= K_TILE:
        return k
    for cand in (512, 384, 256, 128):
        if k % cand == 0:
            return cand
    return k


# ----------------------------------------------------------------------------
# Kernel 1: fused  out = maybe_relu( X @ W + shift [+ R]  or  [+ RX @ RW] )
#
# BN scale is pre-folded into W (and RW); K is tiled on an "arbitrary" grid
# axis with an f32 VMEM accumulator; operands are bf16, accumulation and
# epilogue in f32.  `proj` adds a second (residual-projection) matmul in the
# finalize step so the whole conv3 + bn3 + shortcut-conv + bn + add + relu
# chain is a single kernel.
# ----------------------------------------------------------------------------
def _make_matmul_kernel(apply_relu, residual_mode):
    # residual_mode: None | "add" (tensor residual) | "proj" (residual matmul)
    def kernel(*refs):
        if residual_mode == "add":
            x_ref, w_ref, b_ref, r_ref, o_ref, acc_ref = refs
        elif residual_mode == "proj":
            x_ref, w_ref, b_ref, rx_ref, rw_ref, o_ref, acc_ref = refs
        else:
            x_ref, w_ref, b_ref, o_ref, acc_ref = refs

        @pl.when(pl.program_id(1) == 0)
        def _():
            acc_ref[...] = jnp.zeros_like(acc_ref)

        acc_ref[...] += jnp.dot(x_ref[...], w_ref[...],
                                preferred_element_type=jnp.float32)

        @pl.when(pl.program_id(1) == pl.num_programs(1) - 1)
        def _():
            acc = acc_ref[...] + b_ref[...]
            if residual_mode == "add":
                acc = acc + r_ref[...].astype(jnp.float32)
            elif residual_mode == "proj":
                acc = acc + jnp.dot(rx_ref[...], rw_ref[...],
                                    preferred_element_type=jnp.float32)
            if apply_relu:
                acc = jnp.maximum(acc, 0.0)
            o_ref[...] = acc.astype(o_ref.dtype)

    return kernel


def fused_matmul(x, w, shift, residual=None, res_x=None, res_w=None,
                 relu=True, out_dtype=jnp.bfloat16):
    """x: (M, K) bf16, w: (K, N) bf16 (BN scale folded), shift: (N,) f32.
    residual: optional (M, N) tensor added before ReLU.
    res_x/res_w: optional residual projection (M, Kr) @ (Kr, N) added before
    ReLU (shortcut conv; its BN shift must be pre-summed into `shift`).
    K, Kr and N are multiples of 128 (lane-dense)."""
    M, K = x.shape
    Kw, Nc = w.shape
    assert K == Kw and K % LANE == 0 and Nc % LANE == 0
    assert residual is None or res_x is None

    tm, m_pad = _choose_row_tile(M)
    if m_pad != M:
        x = jnp.pad(x, ((0, m_pad - M), (0, 0)))
        if residual is not None:
            residual = jnp.pad(residual, ((0, m_pad - M), (0, 0)))
        if res_x is not None:
            res_x = jnp.pad(res_x, ((0, m_pad - M), (0, 0)))
    tk = _choose_k_tile(K)
    grid = (m_pad // tm, K // tk)

    in_specs = [
        pl.BlockSpec((tm, tk), lambda i, k: (i, k)),
        pl.BlockSpec((tk, Nc), lambda i, k: (k, 0)),
        pl.BlockSpec((1, Nc), lambda i, k: (0, 0)),
    ]
    args = [x, w, shift.reshape(1, Nc)]

    if residual is not None:
        residual_mode = "add"
        in_specs.append(pl.BlockSpec((tm, Nc), lambda i, k: (i, 0)))
        args.append(residual)
    elif res_x is not None:
        residual_mode = "proj"
        Kr = res_x.shape[1]
        assert res_w.shape == (Kr, Nc) and Kr % LANE == 0
        in_specs.append(pl.BlockSpec((tm, Kr), lambda i, k: (i, 0)))
        in_specs.append(pl.BlockSpec((Kr, Nc), lambda i, k: (0, 0)))
        args.extend([res_x, res_w])
    else:
        residual_mode = None

    out = pl.pallas_call(
        _make_matmul_kernel(relu, residual_mode),
        grid=grid,
        in_specs=in_specs,
        out_specs=pl.BlockSpec((tm, Nc), lambda i, k: (i, 0)),
        out_shape=jax.ShapeDtypeStruct((m_pad, Nc), out_dtype),
        scratch_shapes=[pltpu.VMEM((tm, Nc), jnp.float32)],
        compiler_params=pltpu.CompilerParams(
            dimension_semantics=("parallel", "arbitrary"),
            vmem_limit_bytes=VMEM_LIMIT),
    )(*args)
    return out[:M] if m_pad != M else out


# ----------------------------------------------------------------------------
# Kernel 2: 3x3 conv (+ folded BN + ReLU) as 9 accumulated in-kernel matmuls.
#
# The activation is zero-padded and phase-split by `stride` (space-to-depth: a
# single cheap XLA pass, ~1x the activation bytes -- no 9x im2col buffer).
# Each phase is kept flat as (PH*PW, C); tap (kh, kw) is then a contiguous
# row-window of that flat slab at a constant offset, so every tap is a plain
# 2D slice feeding a lane-dense (Ho*PW, C) x (C, C) MXU matmul.  The PW-Wo
# "spill" columns per output row are garbage and sliced off afterwards.
# ----------------------------------------------------------------------------
def _make_conv3x3_kernel(stride, ho, pw):
    l_out = ho * pw

    def kernel(xph_ref, w_ref, b_ref, o_ref, acc_ref):
        first = True
        for kh in range(3):
            for kw in range(3):
                p = (kh % stride) * stride + (kw % stride)
                off = (kh // stride) * pw + (kw // stride)
                tap = xph_ref[0, p, off:off + l_out, :]
                contrib = jnp.dot(tap, w_ref[kh * 3 + kw],
                                  preferred_element_type=jnp.float32)
                if first:
                    acc_ref[...] = contrib
                    first = False
                else:
                    acc_ref[...] += contrib
        acc = jnp.maximum(acc_ref[...] + b_ref[...], 0.0)
        o_ref[0] = acc.astype(o_ref.dtype)

    return kernel


def conv3x3_bn_relu(y, w9, shift, stride):
    """y: (N, H, W, C) bf16, w9: (9, C, C) bf16 (scale folded), shift: (C,) f32.
    3x3 conv, padding=1, given stride.  Returns (N, Ho, Wo, C) bf16."""
    n, h, w, c = y.shape
    assert c % LANE == 0 and w9.shape == (9, c, c)
    ho = (h - 1) // stride + 1
    wo = (w - 1) // stride + 1
    halo = 2 // stride                  # max tap offset in phase coordinates
    pw = wo + halo
    ph = ho + halo + 1                  # +1 row so flat tap windows can spill
    s2 = stride * stride

    yp = jnp.pad(y, ((0, 0),
                     (1, stride * ph - h - 1),
                     (1, stride * pw - w - 1),
                     (0, 0)))
    yp = yp.reshape(n, ph, stride, pw, stride, c)
    yp = jnp.transpose(yp, (0, 2, 4, 1, 3, 5)).reshape(n, s2, ph * pw, c)

    l_out = ho * pw
    out = pl.pallas_call(
        _make_conv3x3_kernel(stride, ho, pw),
        grid=(n,),
        in_specs=[
            pl.BlockSpec((1, s2, ph * pw, c), lambda i: (i, 0, 0, 0)),
            pl.BlockSpec((9, c, c), lambda i: (0, 0, 0)),
            pl.BlockSpec((1, c), lambda i: (0, 0)),
        ],
        out_specs=pl.BlockSpec((1, l_out, c), lambda i: (i, 0, 0)),
        out_shape=jax.ShapeDtypeStruct((n, l_out, c), jnp.bfloat16),
        scratch_shapes=[pltpu.VMEM((l_out, c), jnp.float32)],
        compiler_params=pltpu.CompilerParams(
            dimension_semantics=("parallel",),
            vmem_limit_bytes=VMEM_LIMIT),
    )(yp, w9, shift.reshape(1, c))
    # drop the `halo` spill columns introduced by the flat shifted-window trick
    return out.reshape(n, ho, pw, c)[:, :, :wo, :]


# ----------------------------------------------------------------------------
# Parameter preparation (done ONCE, outside the per-call path): fold eval-mode
# BN into the weights, pad channels to LANE, cast to bf16.
# TODO(synk): on v7x the prepared weights could additionally be quantized to
#             fp8 with the scales folded into the BN scale.
# ----------------------------------------------------------------------------
def fold_bn(bn, eps=1e-5):
    scale = bn["gamma"] / jnp.sqrt(bn["var"] + eps)
    shift = bn["beta"] - bn["mean"] * scale
    return scale, shift


def prepare_params(p, cin, cmid, cout):
    cin_p, cm_p, cout_p = (_round_up(c, LANE) for c in (cin, cmid, cout))

    s1, b1 = fold_bn(p["bn1"])
    w1 = p["w1"].reshape(cmid, cin).T * s1[None, :]
    s2, b2 = fold_bn(p["bn2"])
    w2 = jnp.transpose(p["w2"], (2, 3, 1, 0)).reshape(9, cmid, cmid) * s2[None, None, :]
    s3, b3 = fold_bn(p["bn3"])
    w3 = p["w3"].reshape(cout, cmid).T * s3[None, :]

    prep = dict(
        w1=jnp.pad(w1, ((0, cin_p - cin), (0, cm_p - cmid))).astype(jnp.bfloat16),
        b1=jnp.pad(b1, (0, cm_p - cmid)).astype(jnp.float32),
        w2=jnp.pad(w2, ((0, 0), (0, cm_p - cmid), (0, cm_p - cmid))).astype(jnp.bfloat16),
        b2=jnp.pad(b2, (0, cm_p - cmid)).astype(jnp.float32),
        w3=jnp.pad(w3, ((0, cm_p - cmid), (0, cout_p - cout))).astype(jnp.bfloat16),
        b3=jnp.pad(b3, (0, cout_p - cout)).astype(jnp.float32),
    )
    if "ws" in p:
        ss, bs = fold_bn(p["bns"])
        ws = p["ws"].reshape(cout, cin).T * ss[None, :]
        prep["ws"] = jnp.pad(ws, ((0, cin_p - cin), (0, cout_p - cout))).astype(jnp.bfloat16)
        prep["bs"] = jnp.pad(bs, (0, cout_p - cout)).astype(jnp.float32)
    return prep


def bottleneck_forward(x_nchw, prep, stride, channels):
    """Pallas Bottleneck.forward (eval-mode BN).  x_nchw: (N, Cin, H, W) f32."""
    cin, cmid, cout = channels
    cin_p, cm_p = prep["w1"].shape
    cout_p = prep["w3"].shape[1]
    n, _, h, w = x_nchw.shape

    # TODO(synk): in a full ResNet keep activations NHWC (and channel-padded)
    # end-to-end so this per-block transpose/pad disappears; it only exists to
    # match the NCHW nn.Module interface.
    x = jnp.transpose(x_nchw, (0, 2, 3, 1))
    x = _pad_last(x, cin_p).astype(jnp.bfloat16)                 # (n, h, w, cin_p)

    # conv1 (1x1) + bn1 + relu
    y1 = fused_matmul(x.reshape(n * h * w, cin_p), prep["w1"], prep["b1"], relu=True)
    y1 = y1.reshape(n, h, w, cm_p)

    # conv2 (3x3, stride, pad=1) + bn2 + relu  (in-kernel 9-tap accumulation)
    y2 = conv3x3_bn_relu(y1, prep["w2"], prep["b2"], stride)
    ho, wo = y2.shape[1], y2.shape[2]
    y2 = y2.reshape(n * ho * wo, cm_p)

    # conv3 (1x1) + bn3 + shortcut + add + relu, all in ONE fused kernel
    if "ws" in prep:
        # Projection shortcut: second matmul fused into the conv3 kernel.
        # TODO(synk): fuse this strided spatial subsample into the kernel via a
        # strided index_map / pl.ds(..., stride) DMA instead of an XLA slice.
        xs = x[:, ::stride, ::stride, :].reshape(n * ho * wo, cin_p)
        out = fused_matmul(y2, prep["w3"], prep["b3"] + prep["bs"],
                           res_x=xs, res_w=prep["ws"],
                           relu=True, out_dtype=jnp.float32)
    else:
        assert cin_p == cout_p
        res = x.reshape(n * h * w, cin_p)          # identity shortcut
        out = fused_matmul(y2, prep["w3"], prep["b3"], residual=res,
                           relu=True, out_dtype=jnp.float32)

    out = out.reshape(n, ho, wo, cout_p)[..., :cout]
    return jnp.transpose(out, (0, 3, 1, 2))        # back to NCHW


# ----------------------------------------------------------------------------
# Pure-JAX reference (mirrors the PyTorch module, eval-mode BN, all f32)
# ----------------------------------------------------------------------------
def ref_bottleneck(x, p, stride):
    def conv(a, w, s, pad):
        return jax.lax.conv_general_dilated(
            a, w, (s, s), [(pad, pad), (pad, pad)],
            dimension_numbers=("NCHW", "OIHW", "NCHW"))

    def bn(a, b):
        sc, sh = fold_bn(b)
        return a * sc[None, :, None, None] + sh[None, :, None, None]

    out = jax.nn.relu(bn(conv(x, p["w1"], 1, 0), p["bn1"]))
    out = jax.nn.relu(bn(conv(out, p["w2"], stride, 1), p["bn2"]))
    out = bn(conv(out, p["w3"], 1, 0), p["bn3"])
    if "ws" in p:
        sc = bn(conv(x, p["ws"], stride, 0), p["bns"])
    else:
        sc = x
    return jax.nn.relu(out + sc)


# ----------------------------------------------------------------------------
# Deterministic parameter init (shapes from Bottleneck.__init__)
# ----------------------------------------------------------------------------
def init_params(key, cin, cmid, stride):
    cout = cmid * 4  # expansion = 4
    keys = jax.random.split(key, 8)

    def bn_params(k, c):
        k1, k2, k3, k4 = jax.random.split(k, 4)
        return dict(
            gamma=jax.random.uniform(k1, (c,), minval=0.5, maxval=1.5),
            beta=jax.random.normal(k2, (c,)) * 0.1,
            mean=jax.random.normal(k3, (c,)) * 0.1,
            var=jax.random.uniform(k4, (c,), minval=0.5, maxval=1.5),
        )

    p = dict(
        w1=jax.random.normal(keys[0], (cmid, cin, 1, 1)) * 0.1,
        bn1=bn_params(keys[1], cmid),
        w2=jax.random.normal(keys[2], (cmid, cmid, 3, 3)) * 0.1,
        bn2=bn_params(keys[3], cmid),
        w3=jax.random.normal(keys[4], (cout, cmid, 1, 1)) * 0.1,
        bn3=bn_params(keys[5], cout),
    )
    if stride != 1 or cin != cout:
        p["ws"] = jax.random.normal(keys[6], (cout, cin, 1, 1)) * 0.1
        p["bns"] = bn_params(keys[7], cout)
    return p


if __name__ == "__main__":
    key = jax.random.PRNGKey(0)
    k_x1, k_p1, k_x2, k_p2 = jax.random.split(key, 4)

    fwd = jax.jit(bottleneck_forward, static_argnums=(2, 3))

    # Case 1: projection shortcut (stride=2, in_channels != 4*out_channels)
    cin1, cmid1, stride1 = 16, 8, 2
    cout1 = 4 * cmid1
    x1 = jax.random.normal(k_x1, (2, cin1, 16, 16), dtype=jnp.float32)
    p1 = init_params(k_p1, cin1, cmid1, stride1)
    prep1 = prepare_params(p1, cin1, cmid1, cout1)
    out1 = jax.block_until_ready(fwd(x1, prep1, stride1, (cin1, cmid1, cout1)))
    ref1 = ref_bottleneck(x1, p1, stride1)
    assert out1.shape == (2, cout1, 8, 8)
    err1 = float(jnp.max(jnp.abs(out1 - ref1)))
    assert jnp.allclose(out1, ref1, atol=5e-2, rtol=5e-2), f"max abs err {err1}"

    # Case 2: identity shortcut (stride=1, in_channels == 4*out_channels)
    cin2, cmid2, stride2 = 32, 8, 1
    cout2 = 4 * cmid2
    x2 = jax.random.normal(k_x2, (2, cin2, 16, 16), dtype=jnp.float32)
    p2 = init_params(k_p2, cin2, cmid2, stride2)
    prep2 = prepare_params(p2, cin2, cmid2, cout2)
    out2 = jax.block_until_ready(fwd(x2, prep2, stride2, (cin2, cmid2, cout2)))
    ref2 = ref_bottleneck(x2, p2, stride2)
    assert out2.shape == (2, cout2, 16, 16)
    err2 = float(jnp.max(jnp.abs(out2 - ref2)))
    assert jnp.allclose(out2, ref2, atol=5e-2, rtol=5e-2), f"max abs err {err2}"

    print("KERNEL_OK")
</pallas_src>

<mosaic_0001>
module attributes {stable_mosaic.version = 11 : i64} {
  func.func @kernel(%arg0: i32, %arg1: i32, %arg2: memref<256x128xbf16, #tpu.memory_space<vmem>>, %arg3: memref<128x128xbf16, #tpu.memory_space<vmem>>, %arg4: memref<1x128xf32, #tpu.memory_space<vmem>>, %arg5: memref<256x128xbf16, #tpu.memory_space<vmem>>, %arg6: memref<256x128xf32, #tpu.memory_space<vmem>>) attributes {dimension_semantics = [#tpu.dimension_semantics<parallel>, #tpu.dimension_semantics<arbitrary>], iteration_bounds = array<i64: 2, 1>, scalar_prefetch = 0 : i64, scratch_operands = 1 : i64, tpu.core_type = #tpu.core_type<tc>, window_params = [{transform_indices = @transform_0, window_bounds = array<i64: 256, 128>}, {transform_indices = @transform_1, window_bounds = array<i64: 128, 128>}, {pipeline_mode = #tpu.pipeline_mode<synchronous>, transform_indices = @transform_2, window_bounds = array<i64: 1, 128>}, {transform_indices = @transform_3, window_bounds = array<i64: 256, 128>}]} {
    %c0_i32 = arith.constant 0 : i32
    %0 = arith.cmpi eq, %arg1, %c0_i32 : i32
    %1 = arith.extui %0 : i1 to i32
    %c0_i32_0 = arith.constant 0 : i32
    %2 = arith.cmpi ne, %1, %c0_i32_0 : i32
    scf.if %2 {
      %cst_10 = arith.constant 0.000000e+00 : f32
      %12 = vector.broadcast %cst_10 : f32 to vector<256x128xf32>
      %c0_11 = arith.constant 0 : index
      %c0_12 = arith.constant 0 : index
      %13 = vector.load %arg6[%c0_11, %c0_12] : memref<256x128xf32, #tpu.memory_space<vmem>>, vector<256x128xf32>
      tpu.vector_store %arg6[%c0_11, %c0_12], %12 {strides = array<i32>} : memref<256x128xf32, #tpu.memory_space<vmem>>, vector<256x128xf32>,
    } else {
    }
    %c0 = arith.constant 0 : index
    %c0_1 = arith.constant 0 : index
    %3 = vector.load %arg6[%c0, %c0_1] : memref<256x128xf32, #tpu.memory_space<vmem>>, vector<256x128xf32>
    %c0_2 = arith.constant 0 : index
    %c0_3 = arith.constant 0 : index
    %4 = vector.load %arg2[%c0_2, %c0_3] : memref<256x128xbf16, #tpu.memory_space<vmem>>, vector<256x128xbf16>
    %c0_4 = arith.constant 0 : index
    %c0_5 = arith.constant 0 : index
    %5 = vector.load %arg3[%c0_4, %c0_5] : memref<128x128xbf16, #tpu.memory_space<vmem>>, vector<128x128xbf16>
    %cst = arith.constant dense<0.000000e+00> : vector<256x128xf32>
    %6 = tpu.matmul %4, %5, %cst {dimension_numbers = #tpu.dot_dimension_numbers<[1], [0], [0], [1], [0, 0, 1, 1], [], []>} : vector<256x128xbf16>, vector<128x128xbf16>, vector<256x128xf32> -> vector<256x128xf32>
    %7 = arith.addf %3, %6 : vector<256x128xf32>
    %c0_6 = arith.constant 0 : index
    %c0_7 = arith.constant 0 : index
    %8 = vector.load %arg6[%c0_6, %c0_7] : memref<256x128xf32, #tpu.memory_space<vmem>>, vector<256x128xf32>
    tpu.vector_store %arg6[%c0_6, %c0_7], %7 {strides = array<i32>} : memref<256x128xf32, #tpu.memory_space<vmem>>, vector<256x128xf32>,
    %c0_i32_8 = arith.constant 0 : i32
    %9 = arith.cmpi eq, %arg1, %c0_i32_8 : i32
    %10 = arith.extui %9 : i1 to i32
    %c0_i32_9 = arith.constant 0 : i32
    %11 = arith.cmpi ne, %10, %c0_i32_9 : i32
    scf.if %11 {
      %c0_10 = arith.constant 0 : index
      %c0_11 = arith.constant 0 : index
      %12 = vector.load %arg6[%c0_10, %c0_11] : memref<256x128xf32, #tpu.memory_space<vmem>>, vector<256x128xf32>
      %c0_12 = arith.constant 0 : index
      %c0_13 = arith.constant 0 : index
      %13 = vector.load %arg4[%c0_12, %c0_13] : memref<1x128xf32, #tpu.memory_space<vmem>>, vector<1x128xf32>
      %14 = vector.broadcast %13 : vector<1x128xf32> to vector<256x128xf32>
      %15 = arith.addf %12, %14 : vector<256x128xf32>
      %cst_14 = arith.constant 0.000000e+00 : f32
      %16 = vector.broadcast %cst_14 : f32 to vector<256x128xf32>
      %17 = arith.maximumf %15, %16 : vector<256x128xf32>
      %18 = arith.truncf %17 : vector<256x128xf32> to vector<256x128xbf16>
      %c0_15 = arith.constant 0 : index
      %c0_16 = arith.constant 0 : index
      %19 = vector.load %arg5[%c0_15, %c0_16] : memref<256x128xbf16, #tpu.memory_space<vmem>>, vector<256x128xbf16>
      tpu.vector_store %arg5[%c0_15, %c0_16], %18 {strides = array<i32>} : memref<256x128xbf16, #tpu.memory_space<vmem>>, vector<256x128xbf16>,
    } else {
    }
    return
  }
  func.func @transform_0(%arg0: i32, %arg1: i32) -> (i32, i32) {
    %c0_i32 = arith.constant 0 : i32
    return %arg0, %arg1 : i32, i32
  }
  func.func @transform_1(%arg0: i32, %arg1: i32) -> (i32, i32) {
    %c0_i32 = arith.constant 0 : i32
    %c0_i32_0 = arith.constant 0 : i32
    return %arg1, %c0_i32 : i32, i32
  }
  func.func @transform_2(%arg0: i32, %arg1: i32) -> (i32, i32) {
    %c0_i32 = arith.constant 0 : i32
    %c0_i32_0 = arith.constant 0 : i32
    %c0_i32_1 = arith.constant 0 : i32
    return %c0_i32, %c0_i32_0 : i32, i32
  }
  func.func @transform_3(%arg0: i32, %arg1: i32) -> (i32, i32) {
    %c0_i32 = arith.constant 0 : i32
    %c0_i32_0 = arith.constant 0 : i32
    return %arg0, %c0_i32 : i32, i32
  }
}

module attributes {stable_mosaic.version = 11 : i64} {
  func.func @kernel(%arg0: i32, %arg1: memref<1x4x90x128xbf16, #tpu.memory_space<vmem>>, %arg2: memref<9x128x128xbf16, #tpu.memory_space<vmem>>, %arg3: memref<1x128xf32, #tpu.memory_space<vmem>>, %arg4: memref<1x72x128xbf16, #tpu.memory_space<vmem>>, %arg5: memref<72x128xf32, #tpu.memory_space<vmem>>) attributes {dimension_semantics = [#tpu.dimension_semantics<parallel>], iteration_bounds = array<i64: 2>, scalar_prefetch = 0 : i64, scratch_operands = 1 : i64, tpu.core_type = #tpu.core_type<tc>, window_params = [{transform_indices = @transform_0, window_bounds = array<i64: 1, 4, 90, 128>}, {pipeline_mode = #tpu.pipeline_mode<synchronous>, transform_indices = @transform_1, window_bounds = array<i64: 9, 128, 128>}, {pipeline_mode = #tpu.pipeline_mode<synchronous>, transform_indices = @transform_2, window_bounds = array<i64: 1, 128>}, {transform_indices = @transform_3, window_bounds = array<i64: 1, 72, 128>}]} {
    %c0 = arith.constant 0 : index
    %c0_0 = arith.constant 0 : index
    %c0_1 = arith.constant 0 : index
    %c0_2 = arith.constant 0 : index
    %0 = vector.load %arg1[%c0, %c0_0, %c0_1, %c0_2] : memref<1x4x90x128xbf16, #tpu.memory_space<vmem>>, vector<1x1x72x128xbf16>
    %1 = vector.shape_cast %0 : vector<1x1x72x128xbf16> to vector<72x128xbf16>
    %c0_3 = arith.constant 0 : index
    %c0_4 = arith.constant 0 : index
    %c0_5 = arith.constant 0 : index
    %2 = vector.load %arg2[%c0_3, %c0_4, %c0_5] : memref<9x128x128xbf16, #tpu.memory_space<vmem>>, vector<1x128x128xbf16>
    %3 = vector.shape_cast %2 : vector<1x128x128xbf16> to vector<128x128xbf16>
    %cst = arith.constant dense<0.000000e+00> : vector<72x128xf32>
    %4 = tpu.matmul %1, %3, %cst {dimension_numbers = #tpu.dot_dimension_numbers<[1], [0], [0], [1], [0, 0, 1, 1], [], []>} : vector<72x128xbf16>, vector<128x128xbf16>, vector<72x128xf32> -> vector<72x128xf32>
    %c0_6 = arith.constant 0 : index
    %c0_7 = arith.constant 0 : index
    %5 = vector.load %arg5[%c0_6, %c0_7] : memref<72x128xf32, #tpu.memory_space<vmem>>, vector<72x128xf32>
    tpu.vector_store %arg5[%c0_6, %c0_7], %4 {strides = array<i32>} : memref<72x128xf32, #tpu.memory_space<vmem>>, vector<72x128xf32>,
    %c0_8 = arith.constant 0 : index
    %c1 = arith.constant 1 : index
    %c0_9 = arith.constant 0 : index
    %c0_10 = arith.constant 0 : index
    %6 = vector.load %arg1[%c0_8, %c1, %c0_9, %c0_10] : memref<1x4x90x128xbf16, #tpu.memory_space<vmem>>, vector<1x1x72x128xbf16>
    %7 = vector.shape_cast %6 : vector<1x1x72x128xbf16> to vector<72x128xbf16>
    %c1_11 = arith.constant 1 : index
    %c0_12 = arith.constant 0 : index
    %c0_13 = arith.constant 0 : index
    %8 = vector.load %arg2[%c1_11, %c0_12, %c0_13] : memref<9x128x128xbf16, #tpu.memory_space<vmem>>, vector<1x128x128xbf16>
    %9 = vector.shape_cast %8 : vector<1x128x128xbf16> to vector<128x128xbf16>
    %cst_14 = arith.constant dense<0.000000e+00> : vector<72x128xf32>
    %10 = tpu.matmul %7, %9, %cst_14 {dimension_numbers = #tpu.dot_dimension_numbers<[1], [0], [0], [1], [0, 0, 1, 1], [], []>} : vector<72x128xbf16>, vector<128x128xbf16>, vector<72x128xf32> -> vector<72x128xf32>
    %c0_15 = arith.constant 0 : index
    %c0_16 = arith.constant 0 : index
    %11 = vector.load %arg5[%c0_15, %c0_16] : memref<72x128xf32, #tpu.memory_space<vmem>>, vector<72x128xf32>
    %12 = arith.addf %11, %10 : vector<72x128xf32>
    %c0_17 = arith.constant 0 : index
    %c0_18 = arith.constant 0 : index
    %13 = vector.load %arg5[%c0_17, %c0_18] : memref<72x128xf32, #tpu.memory_space<vmem>>, vector<72x128xf32>
    tpu.vector_store %arg5[%c0_17, %c0_18], %12 {strides = array<i32>} : memref<72x128xf32, #tpu.memory_space<vmem>>, vector<72x128xf32>,
    %c0_19 = arith.constant 0 : index
    %c0_20 = arith.constant 0 : index
    %c1_21 = arith.constant 1 : index
    %c0_22 = arith.constant 0 : index
    %14 = vector.load %arg1[%c0_19, %c0_20, %c1_21, %c0_22] : memref<1x4x90x128xbf16, #tpu.memory_space<vmem>>, vector<1x1x72x128xbf16>
    %15 = vector.shape_cast %14 : vector<1x1x72x128xbf16> to vector<72x128xbf16>
    %c2 = arith.constant 2 : index
    %c0_23 = arith.constant 0 : index
    %c0_24 = arith.constant 0 : index
    %16 = vector.load %arg2[%c2, %c0_23, %c0_24] : memref<9x128x128xbf16, #tpu.memory_space<vmem>>, vector<1x128x128xbf16>
    %17 = vector.shape_cast %16 : vector<1x128x128xbf16> to vector<128x128xbf16>
    %cst_25 = arith.constant dense<0.000000e+00> : vector<72x128xf32>
    %18 = tpu.matmul %15, %17, %cst_25 {dimension_numbers = #tpu.dot_dimension_numbers<[1], [0], [0], [1], [0, 0, 1, 1], [], []>} : vector<72x128xbf16>, vector<128x128xbf16>, vector<72x128xf32> -> vector<72x128xf32>
    %c0_26 = arith.constant 0 : index
    %c0_27 = arith.constant 0 : index
    %19 = vector.load %arg5[%c0_26, %c0_27] : memref<72x128xf32, #tpu.memory_space<vmem>>, vector<72x128xf32>
    %20 = arith.addf %19, %18 : vector<72x128xf32>
    %c0_28 = arith.constant 0 : index
    %c0_29 = arith.constant 0 : index
    %21 = vector.load %arg5[%c0_28, %c0_29] : memref<72x128xf32, #tpu.memory_space<vmem>>, vector<72x128xf32>
    tpu.vector_store %arg5[%c0_28, %c0_29], %20 {strides = array<i32>} : memref<72x128xf32, #tpu.memory_space<vmem>>, vector<72x128xf32>,
    %c0_30 = arith.constant 0 : index
    %c2_31 = arith.constant 2 : index
    %c0_32 = arith.constant 0 : index
    %c0_33 = arith.constant 0 : index
    %22 = vector.load %arg1[%c0_30, %c2_31, %c0_32, %c0_33] : memref<1x4x90x128xbf16, #tpu.memory_space<vmem>>, vector<1x1x72x128xbf16>
    %23 = vector.shape_cast %22 : vector<1x1x72x128xbf16> to vector<72x128xbf16>
    %c3 = arith.constant 3 : index
    %c0_34 = arith.constant 0 : index
    %c0_35 = arith.constant 0 : index
    %24 = vector.load %arg2[%c3, %c0_34, %c0_35] : memref<9x128x128xbf16, #tpu.memory_space<vmem>>, vector<1x128x128xbf16>
    %25 = vector.shape_cast %24 : vector<1x128x128xbf16> to vector<128x128xbf16>
    %cst_36 = arith.constant dense<0.000000e+00> : vector<72x128xf32>
    %26 = tpu.matmul %23, %25, %cst_36 {dimension_numbers = #tpu.dot_dimension_numbers<[1], [0], [0], [1], [0, 0, 1, 1], [], []>} : vector<72x128xbf16>, vector<128x128xbf16>, vector<72x128xf32> -> vector<72x128xf32>
    %c0_37 = arith.constant 0 : index
    %c0_38 = arith.constant 0 : index
    %27 = vector.load %arg5[%c0_37, %c0_38] : memref<72x128xf32, #tpu.memory_space<vmem>>, vector<72x128xf32>
    %28 = arith.addf %27, %26 : vector<72x128xf32>
    %c0_39 = arith.constant 0 : index
    %c0_40 = arith.constant 0 : index
    %29 = vector.load %arg5[%c0_39, %c0_40] : memref<72x128xf32, #tpu.memory_space<vmem>>, vector<72x128xf32>
    tpu.vector_store %arg5[%c0_39, %c0_40], %28 {strides = array<i32>} : memref<72x128xf32, #tpu.memory_space<vmem>>, vector<72x128xf32>,
    %c0_41 = arith.constant 0 : index
    %c3_42 = arith.constant 3 : index
    %c0_43 = arith.constant 0 : index
    %c0_44 = arith.constant 0 : index
    %30 = vector.load %arg1[%c0_41, %c3_42, %c0_43, %c0_44] : memref<1x4x90x128xbf16, #tpu.memory_space<vmem>>, vector<1x1x72x128xbf16>
    %31 = vector.shape_cast %30 : vector<1x1x72x128xbf16> to vector<72x128xbf16>
    %c4 = arith.constant 4 : index
    %c0_45 = arith.constant 0 : index
    %c0_46 = arith.constant 0 : index
    %32 = vector.load %arg2[%c4, %c0_45, %c0_46] : memref<9x128x128xbf16, #tpu.memory_space<vmem>>, vector<1x128x128xbf16>
    %33 = vector.shape_cast %32 : vector<1x128x128xbf16> to vector<128x128xbf16>
    %cst_47 = arith.constant dense<0.000000e+00> : vector<72x128xf32>
    %34 = tpu.matmul %31, %33, %cst_47 {dimension_numbers = #tpu.dot_dimension_numbers<[1], [0], [0], [1], [0, 0, 1, 1], [], []>} : vector<72x128xbf16>, vector<128x128xbf16>, vector<72x128xf32> -> vector<72x128xf32>
    %c0_48 = arith.constant 0 : index
    %c0_49 = arith.constant 0 : index
    %35 = vector.load %arg5[%c0_48, %c0_49] : memref<72x128xf32, #tpu.memory_space<vmem>>, vector<72x128xf32>
    %36 = arith.addf %35, %34 : vector<72x128xf32>
    %c0_50 = arith.constant 0 : index
    %c0_51 = arith.constant 0 : index
    %37 = vector.load %arg5[%c0_50, %c0_51] : memref<72x128xf32, #tpu.memory_space<vmem>>, vector<72x128xf32>
    tpu.vector_store %arg5[%c0_50, %c0_51], %36 {strides = array<i32>} : memref<72x128xf32, #tpu.memory_space<vmem>>, vector<72x128xf32>,
    %c0_52 = arith.constant 0 : index
    %c2_53 = arith.constant 2 : index
    %c1_54 = arith.constant 1 : index
    %c0_55 = arith.constant 0 : index
    %38 = vector.load %arg1[%c0_52, %c2_53, %c1_54, %c0_55] : memref<1x4x90x128xbf16, #tpu.memory_space<vmem>>, vector<1x1x72x128xbf16>
    %39 = vector.shape_cast %38 : vector<1x1x72x128xbf16> to vector<72x128xbf16>
    %c5 = arith.constant 5 : index
    %c0_56 = arith.constant 0 : index
    %c0_57 = arith.constant 0 : index
    %40 = vector.load %arg2[%c5, %c0_56, %c0_57] : memref<9x128x128xbf16, #tpu.memory_space<vmem>>, vector<1x128x128xbf16>
    %41 = vector.shape_cast %40 : vector<1x128x128xbf16> to vector<128x128xbf16>
    %cst_58 = arith.constant dense<0.000000e+00> : vector<72x128xf32>
    %42 = tpu.matmul %39, %41, %cst_58 {dimension_numbers = #tpu.dot_dimension_numbers<[1], [0], [0], [1], [0, 0, 1, 1], [], []>} : vector<72x128xbf16>, vector<128x128xbf16>, vector<72x128xf32> -> vector<72x128xf32>
    %c0_59 = arith.constant 0 : index
    %c0_60 = arith.constant 0 : index
    %43 = vector.load %arg5[%c0_59, %c0_60] : memref<72x128xf32, #tpu.memory_space<vmem>>, vector<72x128xf32>
    %44 = arith.addf %43, %42 : vector<72x128xf32>
    %c0_61 = arith.constant 0 : index
    %c0_62 = arith.constant 0 : index
    %45 = vector.load %arg5[%c0_61, %c0_62] : memref<72x128xf32, #tpu.memory_space<vmem>>, vector<72x128xf32>
    tpu.vector_store %arg5[%c0_61, %c0_62], %44 {strides = array<i32>} : memref<72x128xf32, #tpu.memory_space<vmem>>, vector<72x128xf32>,
    %c0_63 = arith.constant 0 : index
    %c0_64 = arith.constant 0 : index
    %c9 = arith.constant 9 : index
    %c0_65 = arith.constant 0 : index
    %46 = vector.load %arg1[%c0_63, %c0_64, %c9, %c0_65] : memref<1x4x90x128xbf16, #tpu.memory_space<vmem>>, vector<1x1x72x128xbf16>
    %47 = vector.shape_cast %46 : vector<1x1x72x128xbf16> to vector<72x128xbf16>
    %c6 = arith.constant 6 : index
    %c0_66 = arith.constant 0 : index
    %c0_67 = arith.constant 0 : index
    %48 = vector.load %arg2[%c6, %c0_66, %c0_67] : memref<9x128x128xbf16, #tpu.memory_space<vmem>>, vector<1x128x128xbf16>
    %49 = vector.shape_cast %48 : vector<1x128x128xbf16> to vector<128x128xbf16>
    %cst_68 = arith.constant dense<0.000000e+00> : vector<72x128xf32>
    %50 = tpu.matmul %47, %49, %cst_68 {dimension_numbers = #tpu.dot_dimension_numbers<[1], [0], [0], [1], [0, 0, 1, 1], [], []>} : vector<72x128xbf16>, vector<128x128xbf16>, vector<72x128xf32> -> vector<72x128xf32>
    %c0_69 = arith.constant 0 : index
    %c0_70 = arith.constant 0 : index
    %51 = vector.load %arg5[%c0_69, %c0_70] : memref<72x128xf32, #tpu.memory_space<vmem>>, vector<72x128xf32>
    %52 = arith.addf %51, %50 : vector<72x128xf32>
    %c0_71 = arith.constant 0 : index
    %c0_72 = arith.constant 0 : index
    %53 = vector.load %arg5[%c0_71, %c0_72] : memref<72x128xf32, #tpu.memory_space<vmem>>, vector<72x128xf32>
    tpu.vector_store %arg5[%c0_71, %c0_72], %52 {strides = array<i32>} : memref<72x128xf32, #tpu.memory_space<vmem>>, vector<72x128xf32>,
    %c0_73 = arith.constant 0 : index
    %c1_74 = arith.constant 1 : index
    %c9_75 = arith.constant 9 : index
    %c0_76 = arith.constant 0 : index
    %54 = vector.load %arg1[%c0_73, %c1_74, %c9_75, %c0_76] : memref<1x4x90x128xbf16, #tpu.memory_space<vmem>>, vector<1x1x72x128xbf16>
    %55 = vector.shape_cast %54 : vector<1x1x72x128xbf16> to vector<72x128xbf16>
    %c7 = arith.constant 7 : index
    %c0_77 = arith.constant 0 : index
    %c0_78 = arith.constant 0 : index
    %56 = vector.load %arg2[%c7, %c0_77, %c0_78] : memref<9x128x128xbf16, #tpu.memory_space<vmem>>, vector<1x128x128xbf16>
    %57 = vector.shape_cast %56 : vector<1x128x128xbf16> to vector<128x128xbf16>
    %cst_79 = arith.constant dense<0.000000e+00> : vector<72x128xf32>
    %58 = tpu.matmul %55, %57, %cst_79 {dimension_numbers = #tpu.dot_dimension_numbers<[1], [0], [0], [1], [0, 0, 1, 1], [], []>} : vector<72x128xbf16>, vector<128x128xbf16>, vector<72x128xf32> -> vector<72x128xf32>
    %c0_80 = arith.constant 0 : index
    %c0_81 = arith.constant 0 : index
    %59 = vector.load %arg5[%c0_80, %c0_81] : memref<72x128xf32, #tpu.memory_space<vmem>>, vector<72x128xf32>
    %60 = arith.addf %59, %58 : vector<72x128xf32>
    %c0_82 = arith.constant 0 : index
    %c0_83 = arith.constant 0 : index
    %61 = vector.load %arg5[%c0_82, %c0_83] : memref<72x128xf32, #tpu.memory_space<vmem>>, vector<72x128xf32>
    tpu.vector_store %arg5[%c0_82, %c0_83], %60 {strides = array<i32>} : memref<72x128xf32, #tpu.memory_space<vmem>>, vector<72x128xf32>,
    %c0_84 = arith.constant 0 : index
    %c0_85 = arith.constant 0 : index
    %c10 = arith.constant 10 : index
    %c0_86 = arith.constant 0 : index
    %62 = vector.load %arg1[%c0_84, %c0_85, %c10, %c0_86] : memref<1x4x90x128xbf16, #tpu.memory_space<vmem>>, vector<1x1x72x128xbf16>
    %63 = vector.shape_cast %62 : vector<1x1x72x128xbf16> to vector<72x128xbf16>
    %c8 = arith.constant 8 : index
    %c0_87 = arith.constant 0 : index
    %c0_88 = arith.constant 0 : index
    %64 = vector.load %arg2[%c8, %c0_87, %c0_88] : memref<9x128x128xbf16, #tpu.memory_space<vmem>>, vector<1x128x128xbf16>
    %65 = vector.shape_cast %64 : vector<1x128x128xbf16> to vector<128x128xbf16>
    %cst_89 = arith.constant dense<0.000000e+00> : vector<72x128xf32>
    %66 = tpu.matmul %63, %65, %cst_89 {dimension_numbers = #tpu.dot_dimension_numbers<[1], [0], [0], [1], [0, 0, 1, 1], [], []>} : vector<72x128xbf16>, vector<128x128xbf16>, vector<72x128xf32> -> vector<72x128xf32>
    %c0_90 = arith.constant 0 : index
    %c0_91 = arith.constant 0 : index
    %67 = vector.load %arg5[%c0_90, %c0_91] : memref<72x128xf32, #tpu.memory_space<vmem>>, vector<72x128xf32>
    %68 = arith.addf %67, %66 : vector<72x128xf32>
    %c0_92 = arith.constant 0 : index
    %c0_93 = arith.constant 0 : index
    %69 = vector.load %arg5[%c0_92, %c0_93] : memref<72x128xf32, #tpu.memory_space<vmem>>, vector<72x128xf32>
    tpu.vector_store %arg5[%c0_92, %c0_93], %68 {strides = array<i32>} : memref<72x128xf32, #tpu.memory_space<vmem>>, vector<72x128xf32>,
    %c0_94 = arith.constant 0 : index
    %c0_95 = arith.constant 0 : index
    %70 = vector.load %arg5[%c0_94, %c0_95] : memref<72x128xf32, #tpu.memory_space<vmem>>, vector<72x128xf32>
    %c0_96 = arith.constant 0 : index
    %c0_97 = arith.constant 0 : index
    %71 = vector.load %arg3[%c0_96, %c0_97] : memref<1x128xf32, #tpu.memory_space<vmem>>, vector<1x128xf32>
    %72 = vector.broadcast %71 : vector<1x128xf32> to vector<72x128xf32>
    %73 = arith.addf %70, %72 : vector<72x128xf32>
    %cst_98 = arith.constant 0.000000e+00 : f32
    %74 = vector.broadcast %cst_98 : f32 to vector<72x128xf32>
    %75 = arith.maximumf %73, %74 : vector<72x128xf32>
    %76 = arith.truncf %75 : vector<72x128xf32> to vector<72x128xbf16>
    %c0_99 = arith.constant 0 : index
    %c0_100 = arith.constant 0 : index
    %c0_101 = arith.constant 0 : index
    %77 = vector.load %arg4[%c0_99, %c0_100, %c0_101] : memref<1x72x128xbf16, #tpu.memory_space<vmem>>, vector<1x72x128xbf16>
    %78 = vector.shape_cast %77 : vector<1x72x128xbf16> to vector<72x128xbf16>
    %79 = vector.shape_cast %76 : vector<72x128xbf16> to vector<1x72x128xbf16>
    tpu.vector_store %arg4[%c0_99, %c0_100, %c0_101], %79 {strides = array<i32>} : memref<1x72x128xbf16, #tpu.memory_space<vmem>>, vector<1x72x128xbf16>,
    return
  }
  func.func @transform_0(%arg0: i32) -> (i32, i32, i32, i32) {
    %c0_i32 = arith.constant 0 : i32
    %c0_i32_0 = arith.constant 0 : i32
    %c0_i32_1 = arith.constant 0 : i32
    %c0_i32_2 = arith.constant 0 : i32
    return %arg0, %c0_i32, %c0_i32_0, %c0_i32_1 : i32, i32, i32, i32
  }
  func.func @transform_1(%arg0: i32) -> (i32, i32, i32) {
    %c0_i32 = arith.constant 0 : i32
    %c0_i32_0 = arith.constant 0 : i32
    %c0_i32_1 = arith.constant 0 : i32
    %c0_i32_2 = arith.constant 0 : i32
    return %c0_i32, %c0_i32_0, %c0_i32_1 : i32, i32, i32
  }
  func.func @transform_2(%arg0: i32) -> (i32, i32) {
    %c0_i32 = arith.constant 0 : i32
    %c0_i32_0 = arith.constant 0 : i32
    %c0_i32_1 = arith.constant 0 : i32
    return %c0_i32, %c0_i32_0 : i32, i32
  }
  func.func @transform_3(%arg0: i32) -> (i32, i32, i32) {
    %c0_i32 = arith.constant 0 : i32
    %c0_i32_0 = arith.constant 0 : i32
    %c0_i32_1 = arith.constant 0 : i32
    return %arg0, %c0_i32, %c0_i32_0 : i32, i32, i32
  }
}

module attributes {stable_mosaic.version = 11 : i64} {
  func.func @kernel(%arg0: i32, %arg1: i32, %arg2: memref<64x128xbf16, #tpu.memory_space<vmem>>, %arg3: memref<128x128xbf16, #tpu.memory_space<vmem>>, %arg4: memref<1x128xf32, #tpu.memory_space<vmem>>, %arg5: memref<64x128xbf16, #tpu.memory_space<vmem>>, %arg6: memref<128x128xbf16, #tpu.memory_space<vmem>>, %arg7: memref<64x128xf32, #tpu.memory_space<vmem>>, %arg8: memref<64x128xf32, #tpu.memory_space<vmem>>) attributes {dimension_semantics = [#tpu.dimension_semantics<parallel>, #tpu.dimension_semantics<arbitrary>], iteration_bounds = array<i64: 2, 1>, scalar_prefetch = 0 : i64, scratch_operands = 1 : i64, tpu.core_type = #tpu.core_type<tc>, window_params = [{transform_indices = @transform_0, window_bounds = array<i64: 64, 128>}, {transform_indices = @transform_1, window_bounds = array<i64: 128, 128>}, {pipeline_mode = #tpu.pipeline_mode<synchronous>, transform_indices = @transform_2, window_bounds = array<i64: 1, 128>}, {transform_indices = @transform_3, window_bounds = array<i64: 64, 128>}, {pipeline_mode = #tpu.pipeline_mode<synchronous>, transform_indices = @transform_4, window_bounds = array<i64: 128, 128>}, {transform_indices = @transform_5, window_bounds = array<i64: 64, 128>}]} {
    %c0_i32 = arith.constant 0 : i32
    %0 = arith.cmpi eq, %arg1, %c0_i32 : i32
    %1 = arith.extui %0 : i1 to i32
    %c0_i32_0 = arith.constant 0 : i32
    %2 = arith.cmpi ne, %1, %c0_i32_0 : i32
    scf.if %2 {
      %cst_10 = arith.constant 0.000000e+00 : f32
      %12 = vector.broadcast %cst_10 : f32 to vector<64x128xf32>
      %c0_11 = arith.constant 0 : index
      %c0_12 = arith.constant 0 : index
      %13 = vector.load %arg8[%c0_11, %c0_12] : memref<64x128xf32, #tpu.memory_space<vmem>>, vector<64x128xf32>
      tpu.vector_store %arg8[%c0_11, %c0_12], %12 {strides = array<i32>} : memref<64x128xf32, #tpu.memory_space<vmem>>, vector<64x128xf32>,
    } else {
    }
    %c0 = arith.constant 0 : index
    %c0_1 = arith.constant 0 : index
    %3 = vector.load %arg8[%c0, %c0_1] : memref<64x128xf32, #tpu.memory_space<vmem>>, vector<64x128xf32>
    %c0_2 = arith.constant 0 : index
    %c0_3 = arith.constant 0 : index
    %4 = vector.load %arg2[%c0_2, %c0_3] : memref<64x128xbf16, #tpu.memory_space<vmem>>, vector<64x128xbf16>
    %c0_4 = arith.constant 0 : index
    %c0_5 = arith.constant 0 : index
    %5 = vector.load %arg3[%c0_4, %c0_5] : memref<128x128xbf16, #tpu.memory_space<vmem>>, vector<128x128xbf16>
    %cst = arith.constant dense<0.000000e+00> : vector<64x128xf32>
    %6 = tpu.matmul %4, %5, %cst {dimension_numbers = #tpu.dot_dimension_numbers<[1], [0], [0], [1], [0, 0, 1, 1], [], []>} : vector<64x128xbf16>, vector<128x128xbf16>, vector<64x128xf32> -> vector<64x128xf32>
    %7 = arith.addf %3, %6 : vector<64x128xf32>
    %c0_6 = arith.constant 0 : index
    %c0_7 = arith.constant 0 : index
    %8 = vector.load %arg8[%c0_6, %c0_7] : memref<64x128xf32, #tpu.memory_space<vmem>>, vector<64x128xf32>
    tpu.vector_store %arg8[%c0_6, %c0_7], %7 {strides = array<i32>} : memref<64x128xf32, #tpu.memory_space<vmem>>, vector<64x128xf32>,
    %c0_i32_8 = arith.constant 0 : i32
    %9 = arith.cmpi eq, %arg1, %c0_i32_8 : i32
    %10 = arith.extui %9 : i1 to i32
    %c0_i32_9 = arith.constant 0 : i32
    %11 = arith.cmpi ne, %10, %c0_i32_9 : i32
    scf.if %11 {
      %c0_10 = arith.constant 0 : index
      %c0_11 = arith.constant 0 : index
      %12 = vector.load %arg8[%c0_10, %c0_11] : memref<64x128xf32, #tpu.memory_space<vmem>>, vector<64x128xf32>
      %c0_12 = arith.constant 0 : index
      %c0_13 = arith.constant 0 : index
      %13 = vector.load %arg4[%c0_12, %c0_13] : memref<1x128xf32, #tpu.memory_space<vmem>>, vector<1x128xf32>
      %14 = vector.broadcast %13 : vector<1x128xf32> to vector<64x128xf32>
      %15 = arith.addf %12, %14 : vector<64x128xf32>
      %c0_14 = arith.constant 0 : index
      %c0_15 = arith.constant 0 : index
      %16 = vector.load %arg5[%c0_14, %c0_15] : memref<64x128xbf16, #tpu.memory_space<vmem>>, vector<64x128xbf16>
      %c0_16 = arith.constant 0 : index
      %c0_17 = arith.constant 0 : index
      %17 = vector.load %arg6[%c0_16, %c0_17] : memref<128x128xbf16, #tpu.memory_space<vmem>>, vector<128x128xbf16>
      %cst_18 = arith.constant dense<0.000000e+00> : vector<64x128xf32>
      %18 = tpu.matmul %16, %17, %cst_18 {dimension_numbers = #tpu.dot_dimension_numbers<[1], [0], [0], [1], [0, 0, 1, 1], [], []>} : vector<64x128xbf16>, vector<128x128xbf16>, vector<64x128xf32> -> vector<64x128xf32>
      %19 = arith.addf %15, %18 : vector<64x128xf32>
      %cst_19 = arith.constant 0.000000e+00 : f32
      %20 = vector.broadcast %cst_19 : f32 to vector<64x128xf32>
      %21 = arith.maximumf %19, %20 : vector<64x128xf32>
      %c0_20 = arith.constant 0 : index
      %c0_21 = arith.constant 0 : index
      %22 = vector.load %arg7[%c0_20, %c0_21] : memref<64x128xf32, #tpu.memory_space<vmem>>, vector<64x128xf32>
      tpu.vector_store %arg7[%c0_20, %c0_21], %21 {strides = array<i32>} : memref<64x128xf32, #tpu.memory_space<vmem>>, vector<64x128xf32>,
    } else {
    }
    return
  }
  func.func @transform_0(%arg0: i32, %arg1: i32) -> (i32, i32) {
    %c0_i32 = arith.constant 0 : i32
    return %arg0, %arg1 : i32, i32
  }
  func.func @transform_1(%arg0: i32, %arg1: i32) -> (i32, i32) {
    %c0_i32 = arith.constant 0 : i32
    %c0_i32_0 = arith.constant 0 : i32
    return %arg1, %c0_i32 : i32, i32
  }
  func.func @transform_2(%arg0: i32, %arg1: i32) -> (i32, i32) {
    %c0_i32 = arith.constant 0 : i32
    %c0_i32_0 = arith.constant 0 : i32
    %c0_i32_1 = arith.constant 0 : i32
    return %c0_i32, %c0_i32_0 : i32, i32
  }
  func.func @transform_3(%arg0: i32, %arg1: i32) -> (i32, i32) {
    %c0_i32 = arith.constant 0 : i32
    %c0_i32_0 = arith.constant 0 : i32
    return %arg0, %c0_i32 : i32, i32
  }
  func.func @transform_4(%arg0: i32, %arg1: i32) -> (i32, i32) {
    %c0_i32 = arith.constant 0 : i32
    %c0_i32_0 = arith.constant 0 : i32
    %c0_i32_1 = arith.constant 0 : i32
    return %c0_i32, %c0_i32_0 : i32, i32
  }
  func.func @transform_5(%arg0: i32, %arg1: i32) -> (i32, i32) {
    %c0_i32 = arith.constant 0 : i32
    %c0_i32_0 = arith.constant 0 : i32
    return %arg0, %c0_i32 : i32, i32
  }
}

</mosaic_0001>

<bundles_post_ra>
// kernel: bottleneck_forward.3
= control target key start
LH: loop header
LB: loop body
LE: loop exit
PB: predicated region body
PF: predicated region fallthrough
CT: control target
= control target key end

     0   :  { %s1430_s12 = smov 0   ;;  %s1432_s13 = smov 0   ;;  %s1567_s0 = inlined_call_operand.vmem [shape: bf16[512,128], index: 0, kind: input, shape index: {}]   ;;  %s1568_s1 = inlined_call_operand.vmem [shape: bf16[128,128], index: 1, kind: input, shape index: {}]   ;;  %s1569_s2 = inlined_call_operand.vmem [shape: f32[1,128], index: 2, kind: input, shape index: {}]   ;;  %s1570_s3 = inlined_call_operand.vmem [shape: bf16[512,128], index: 3, kind: output, shape index: {}]  }
   0x1   :  { %s1434_s14 = smov 0  }
   0x2 LB: > { %s25_s15 = sadd.s32 1, %s1404_s13  ;;  %p1059_p0 = scmp.ge.s32.totalorder %s1408_s14, 1  ;;  %s1408_s14 = sphi %s1434_s14, %s13_s14   ;;  %s1404_s13 = sphi %s1432_s13, %s1572_s13   ;;  %s1400_s12 = sphi %s1430_s12, %s1571_s12  }
   0x3   : > { %p27_p1 = scmp.ge.s32.totalorder %s25_s15, 2  ;;  %p166_p2 = scmp.lt.s32.totalorder %s1408_s14, 3 }
   0x5   : > { %s1574_s15 = smov (%p27_p1, %s25_s15), 0  ;;  %p167_p3 = pnand %p1059_p0, %p166_p2 }
   0x6   : > { %s1060_s18 = sshll.u32 (!%p167_p3), %s1400_s12, 5 }
   0x7   : > { %170 = sbr.rel (%p167_p3) target bundleno = 275 (0x113), region = 32  ;;  %p199_p4 = scmp.lt.s32.totalorder (!%p167_p3), %s1060_s18, 63 }
   0xc   : > { %v1362_v0 = vld [vmem:[%s1568_s1 + $0x38] sm:$0xff]   ;;  %v1363_v1 = vld [vmem:[%s1568_s1 + $0x30] sm:$0xff]   ;;  %s1576_s18 = smov (!%p199_p4, %s1060_s18), 63  ;;  %v1364_v2 = vld [vmem:[%s1568_s1 + $0x28] sm:$0xff]  }
   0xd   : > { %1274 = vmatprep.subr.bf16.mxu0 %v1362_v0  ;;  %1322 = vmatprep.subr.bf16.mxu1 %v1362_v0  ;;  %s1061_s23 = sshll.u32 %s1576_s18, 2  ;;  %v1365_v3 = vld [vmem:[%s1568_s1 + $0x20] sm:$0xff]   ;;  %v1366_v6 = vld [vmem:[%s1568_s1 + $0x18] sm:$0xff]   ;;  %v1367_v7 = vld [vmem:[%s1568_s1 + $0x10] sm:$0xff]  }
   0xe   : > { %1275 = vmatpush3.bf16.msra.mxu0 %v1362_v0  ;;  %1330 = vmatpush3.bf16.msra.mxu1 %v1362_v0  ;;  %s1465_s26 = scalar_lea.vmem %s1567_s0, %s1061_s23  ;;  %v1368_v8 = vld [vmem:[%s1568_s1 + $0x8] sm:$0xff]   ;;  %v1369_v9 = vld [vmem:[%s1568_s1] sm:$0xff]   ;;  %s1516_s17 = scalar_lea.vmem %s1570_s3, %s1061_s23 }
   0xf   : > { %1276 = vmatprep.subr.bf16.mxu0 %v1363_v1  ;;  %1323 = vmatprep.subr.bf16.mxu1 %v1363_v1  ;;  %v1370_v4 = vld [vmem:[%s1465_s26] sm:$0xff]   ;;  %v1372_v10 = vld [vmem:[%s1465_s26 + $0x8] sm:$0xff]   ;;  %v1374_v12 = vld [vmem:[%s1465_s26 + $0x10] sm:$0xff]  }
  0x10   : > { %v1371_v5 = vld [vmem:[%s1465_s26 + $0x40] sm:$0xff]   ;;  %1290 = vmatprep.mubr.bf16.mxu0 %v1370_v4  ;;  %v1373_v11 = vld [vmem:[%s1465_s26 + $0x48] sm:$0xff]   ;;  %v1375_v13 = vld [vmem:[%s1465_s26 + $0x50] sm:$0xff]  }
  0x11   : > { %1306 = vmatprep.mubr.bf16.mxu1 %v1371_v5  ;;  %v1376_v14 = vld [vmem:[%s1465_s26 + $0x18] sm:$0xff]   ;;  %v1378_v16 = vld [vmem:[%s1465_s26 + $0x20] sm:$0xff]   ;;  %v1380_v18 = vld [vmem:[%s1465_s26 + $0x28] sm:$0xff]  }
  0x12   : > { %1277 = vmatpush3.bf16.msra.mxu0 %v1363_v1  ;;  %1331 = vmatpush3.bf16.msra.mxu1 %v1363_v1  ;;  %v1377_v15 = vld [vmem:[%s1465_s26 + $0x58] sm:$0xff]   ;;  %v1379_v17 = vld [vmem:[%s1465_s26 + $0x60] sm:$0xff]   ;;  %v1381_v19 = vld [vmem:[%s1465_s26 + $0x68] sm:$0xff]  }
  0x13   : > { %1278 = vmatprep.subr.bf16.mxu0 %v1364_v2  ;;  %1324 = vmatprep.subr.bf16.mxu1 %v1364_v2  ;;  %v1382_v20 = vld [vmem:[%s1465_s26 + $0x30] sm:$0xff]   ;;  %v1384_v22 = vld [vmem:[%s1465_s26 + $0x38] sm:$0xff]   ;;  %v1501_v24 = vld [vmem:[%s1569_s2] ss:$0 sm:$0xff] }
  0x14   : > { %v1383_v21 = vld [vmem:[%s1465_s26 + $0x70] sm:$0xff]   ;;  %v1385_v23 = vld [vmem:[%s1465_s26 + $0x78] sm:$0xff]  }
  0x16   : > { %1279 = vmatpush3.bf16.msra.mxu0 %v1364_v2  ;;  %1332 = vmatpush3.bf16.msra.mxu1 %v1364_v2 }
  0x17   : > { %1280 = vmatprep.subr.bf16.mxu0 %v1365_v3  ;;  %1325 = vmatprep.subr.bf16.mxu1 %v1365_v3 }
  0x1a   : > { %1281 = vmatpush3.bf16.msra.mxu0 %v1365_v3  ;;  %1333 = vmatpush3.bf16.msra.mxu1 %v1365_v3 }
  0x1b   : > { %1282 = vmatprep.subr.bf16.mxu0 %v1366_v6  ;;  %1326 = vmatprep.subr.bf16.mxu1 %v1366_v6 }
  0x1e   : > { %1283 = vmatpush3.bf16.msra.mxu0 %v1366_v6  ;;  %1334 = vmatpush3.bf16.msra.mxu1 %v1366_v6 }
  0x1f   : > { %1284 = vmatprep.subr.bf16.mxu0 %v1367_v7  ;;  %1327 = vmatprep.subr.bf16.mxu1 %v1367_v7 }
  0x22   : > { %1285 = vmatpush3.bf16.msra.mxu0 %v1367_v7  ;;  %1335 = vmatpush3.bf16.msra.mxu1 %v1367_v7 }
  0x23   : > { %1286 = vmatprep.subr.bf16.mxu0 %v1368_v8  ;;  %1328 = vmatprep.subr.bf16.mxu1 %v1368_v8 }
  0x26   : > { %1287 = vmatpush3.bf16.msra.mxu0 %v1368_v8  ;;  %1336 = vmatpush3.bf16.msra.mxu1 %v1368_v8 }
  0x27   : > { %1288 = vmatprep.subr.bf16.mxu0 %v1369_v9  ;;  %1329 = vmatprep.subr.bf16.mxu1 %v1369_v9 }
  0x2a   : > { %1289 = vmatpush3.bf16.msra.mxu0 %v1369_v9  ;;  %1337 = vmatpush3.bf16.msra.mxu1 %v1369_v9 }
  0x2d   : > { %1291 = vmatmul.mubr.bf16.vlgmr.msra.gmra.mxu0 %v1372_v10  ;;  %1307 = vmatmul.mubr.bf16.vlgmr.msra.gmra.mxu1 %v1373_v11 }
  0x2e   : > { %1294 = vmatprep.mubr.bf16.mxu0 %v1374_v12  ;;  %1310 = vmatprep.mubr.bf16.mxu1 %v1375_v13 }
  0x35   : > { %1295 = vmatmul.mubr.bf16.gmra.mxu0 %v1376_v14  ;;  %1311 = vmatmul.mubr.bf16.gmra.mxu1 %v1377_v15 }
  0x36   : > { %1298 = vmatprep.mubr.bf16.mxu0 %v1378_v16  ;;  %1314 = vmatprep.mubr.bf16.mxu1 %v1379_v17 }
  0x3d   : > { %1299 = vmatmul.mubr.bf16.gmra.mxu0 %v1380_v18  ;;  %1315 = vmatmul.mubr.bf16.gmra.mxu1 %v1381_v19 }
  0x3e   : > { %1302 = vmatprep.mubr.bf16.mxu0 %v1382_v20  ;;  %1318 = vmatprep.mubr.bf16.mxu1 %v1383_v21 }
  0x45   : > { %1303 = vmatmul.mubr.bf16.gmra.mxu0 %v1384_v22  ;;  %1319 = vmatmul.mubr.bf16.gmra.mxu1 %v1385_v23 }
  0xed   : > { %v1292_v25 = vpop.f32.mrf.mxu0  ;;  %v1308_v26 = vpop.f32.mrf.mxu1 }
  0xee   : > { %v749_v27 = vadd.f32 %v1292_v25, %v1501_v24  ;;  %v765_v28 = vadd.f32 %v1308_v26, %v1501_v24 }
  0xef   : > { %v514_v29 = vpop.f32.mrf.mxu0  ;;  %v578_v30 = vpop.f32.mrf.mxu1 }
  0xf0   : > { %v747_v31 = vadd.f32 %v1501_v24, %v514_v29  ;;  %v763_v32 = vadd.f32 %v1501_v24, %v578_v30  ;;  %v781_v37 = vmax.f32 %v749_v27, 0.0  ;;  %v797_v38 = vmax.f32 %v765_v28, 0.0 }
  0xf1   : > { %v1293_v33 = vpop.f32.mrf.mxu0  ;;  %v1309_v34 = vpop.f32.mrf.mxu1 }
  0xf2   : > { %v750_v35 = vadd.f32 %v1293_v33, %v1501_v24  ;;  %v766_v36 = vadd.f32 %v1309_v34, %v1501_v24  ;;  %v779_v45 = vmax.f32 %v747_v31, 0.0  ;;  %v795_v46 = vmax.f32 %v763_v32, 0.0 }
  0xf3   : > { %v517_v39 = vpop.f32.mrf.mxu0  ;;  %v581_v40 = vpop.f32.mrf.mxu1 }
  0xf4   : > { %v782_v41 = vmax.f32 %v750_v35, 0.0  ;;  %v798_v42 = vmax.f32 %v766_v36, 0.0  ;;  %v748_v43 = vadd.f32 %v1501_v24, %v517_v39  ;;  %v764_v44 = vadd.f32 %v1501_v24, %v581_v40 }
  0xf5   : > { %v1296_v47 = vpop.f32.mrf.mxu0  ;;  %v1312_v48 = vpop.f32.mrf.mxu1 }
  0xf6   : > { %v1163_v49 = vpack.c.bf16 %v782_v41, %v781_v37  ;;  %v1203_v50 = vpack.c.bf16 %v798_v42, %v797_v38  ;;  %v780_v51 = vmax.f32 %v748_v43, 0.0  ;;  %v796_v52 = vmax.f32 %v764_v44, 0.0 }
  0xf7   : > { %v753_v53 = vadd.f32 %v1296_v47, %v1501_v24  ;;  %v769_v54 = vadd.f32 %v1312_v48, %v1501_v24  ;;  %v530_v55 = vpop.f32.mrf.mxu0  ;;  %v594_v56 = vpop.f32.mrf.mxu1 }
  0xf8   : > { %1235 = vst [vmem:[%s1516_s17 + $0x8] sm:$0xff] %v1163_v49   ;;  %1243 = vst [vmem:[%s1516_s17 + $0x48] sm:$0xff] %v1203_v50   ;;  %v1158_v57 = vpack.c.bf16 %v780_v51, %v779_v45  ;;  %v1198_v58 = vpack.c.bf16 %v796_v52, %v795_v46  ;;  %v751_v59 = vadd.f32 %v1501_v24, %v530_v55 }
  0xf9   : > { %v767_v60 = vadd.f32 %v1501_v24, %v594_v56  ;;  %v1297_v61 = vpop.f32.mrf.mxu0  ;;  %v1313_v62 = vpop.f32.mrf.mxu1  ;;  %v785_v1 = vmax.f32 %v753_v53, 0.0  ;;  %v801_v2 = vmax.f32 %v769_v54, 0.0 }
  0xfa   : > { %1159 = vst [vmem:[%s1516_s17] sm:$0xff] %v1158_v57   ;;  %1242 = vst [vmem:[%s1516_s17 + $0x40] sm:$0xff] %v1198_v58   ;;  %v754_v63 = vadd.f32 %v1297_v61, %v1501_v24  ;;  %v770_v0 = vadd.f32 %v1313_v62, %v1501_v24  ;;  %v783_v9 = vmax.f32 %v751_v59, 0.0 }
  0xfb   : > { %v533_v3 = vpop.f32.mrf.mxu0  ;;  %v597_v4 = vpop.f32.mrf.mxu1  ;;  %v799_v10 = vmax.f32 %v767_v60, 0.0 }
  0xfc   : > { %v786_v5 = vmax.f32 %v754_v63, 0.0  ;;  %v802_v6 = vmax.f32 %v770_v0, 0.0  ;;  %v752_v7 = vadd.f32 %v1501_v24, %v533_v3  ;;  %v768_v8 = vadd.f32 %v1501_v24, %v597_v4 }
  0xfd   : > { %v1300_v11 = vpop.f32.mrf.mxu0  ;;  %v1316_v12 = vpop.f32.mrf.mxu1 }
  0xfe   : > { %v1173_v13 = vpack.c.bf16 %v786_v5, %v785_v1  ;;  %v1213_v14 = vpack.c.bf16 %v802_v6, %v801_v2  ;;  %v784_v15 = vmax.f32 %v752_v7, 0.0  ;;  %v800_v16 = vmax.f32 %v768_v8, 0.0 }
  0xff   : > { %v757_v17 = vadd.f32 %v1300_v11, %v1501_v24  ;;  %v773_v18 = vadd.f32 %v1316_v12, %v1501_v24  ;;  %v546_v19 = vpop.f32.mrf.mxu0  ;;  %v610_v20 = vpop.f32.mrf.mxu1 }
 0x100   : > { %1237 = vst [vmem:[%s1516_s17 + $0x18] sm:$0xff] %v1173_v13   ;;  %1245 = vst [vmem:[%s1516_s17 + $0x58] sm:$0xff] %v1213_v14   ;;  %v1168_v21 = vpack.c.bf16 %v784_v15, %v783_v9  ;;  %v1208_v22 = vpack.c.bf16 %v800_v16, %v799_v10  ;;  %v755_v23 = vadd.f32 %v1501_v24, %v546_v19 }
 0x101   : > { %v771_v25 = vadd.f32 %v1501_v24, %v610_v20  ;;  %v1301_v26 = vpop.f32.mrf.mxu0  ;;  %v1317_v27 = vpop.f32.mrf.mxu1  ;;  %v789_v30 = vmax.f32 %v757_v17, 0.0  ;;  %v805_v31 = vmax.f32 %v773_v18, 0.0 }
 0x102   : > { %1236 = vst [vmem:[%s1516_s17 + $0x10] sm:$0xff] %v1168_v21   ;;  %1244 = vst [vmem:[%s1516_s17 + $0x50] sm:$0xff] %v1208_v22   ;;  %v758_v28 = vadd.f32 %v1301_v26, %v1501_v24  ;;  %v774_v29 = vadd.f32 %v1317_v27, %v1501_v24  ;;  %v787_v38 = vmax.f32 %v755_v23, 0.0 }
 0x103   : > { %v549_v32 = vpop.f32.mrf.mxu0  ;;  %v613_v33 = vpop.f32.mrf.mxu1  ;;  %v803_v39 = vmax.f32 %v771_v25, 0.0 }
 0x104   : > { %v790_v34 = vmax.f32 %v758_v28, 0.0  ;;  %v806_v35 = vmax.f32 %v774_v29, 0.0  ;;  %v756_v36 = vadd.f32 %v1501_v24, %v549_v32  ;;  %v772_v37 = vadd.f32 %v1501_v24, %v613_v33 }
 0x105   : > { %v1304_v40 = vpop.f32.mrf.mxu0  ;;  %v1320_v41 = vpop.f32.mrf.mxu1 }
 0x106   : > { %v1183_v42 = vpack.c.bf16 %v790_v34, %v789_v30  ;;  %v1223_v43 = vpack.c.bf16 %v806_v35, %v805_v31  ;;  %v788_v44 = vmax.f32 %v756_v36, 0.0  ;;  %v804_v45 = vmax.f32 %v772_v37, 0.0 }
 0x107   : > { %v761_v46 = vadd.f32 %v1304_v40, %v1501_v24  ;;  %v777_v47 = vadd.f32 %v1320_v41, %v1501_v24  ;;  %v562_v48 = vpop.f32.mrf.mxu0  ;;  %v626_v49 = vpop.f32.mrf.mxu1 }
 0x108   : > { %1239 = vst [vmem:[%s1516_s17 + $0x28] sm:$0xff] %v1183_v42   ;;  %1247 = vst [vmem:[%s1516_s17 + $0x68] sm:$0xff] %v1223_v43   ;;  %v1178_v50 = vpack.c.bf16 %v788_v44, %v787_v38  ;;  %v1218_v51 = vpack.c.bf16 %v804_v45, %v803_v39  ;;  %v759_v52 = vadd.f32 %v1501_v24, %v562_v48 }
 0x109   : > { %v775_v53 = vadd.f32 %v1501_v24, %v626_v49  ;;  %v1305_v54 = vpop.f32.mrf.mxu0  ;;  %v1321_v55 = vpop.f32.mrf.mxu1  ;;  %v793_v58 = vmax.f32 %v761_v46, 0.0  ;;  %v809_v59 = vmax.f32 %v777_v47, 0.0 }
 0x10a   : > { %1238 = vst [vmem:[%s1516_s17 + $0x20] sm:$0xff] %v1178_v50   ;;  %1246 = vst [vmem:[%s1516_s17 + $0x60] sm:$0xff] %v1218_v51   ;;  %v762_v56 = vadd.f32 %v1305_v54, %v1501_v24  ;;  %v778_v57 = vadd.f32 %v1321_v55, %v1501_v24  ;;  %v791_v2 = vmax.f32 %v759_v52, 0.0 }
 0x10b   : > { %v565_v60 = vpop.f32.mrf.mxu0  ;;  %v629_v61 = vpop.f32.mrf.mxu1  ;;  %v807_v3 = vmax.f32 %v775_v53, 0.0 }
 0x10c   : > { %v794_v62 = vmax.f32 %v762_v56, 0.0  ;;  %v810_v63 = vmax.f32 %v778_v57, 0.0  ;;  %v760_v0 = vadd.f32 %v1501_v24, %v565_v60  ;;  %v776_v1 = vadd.f32 %v1501_v24, %v629_v61 }
 0x10e   : > { %v1193_v4 = vpack.c.bf16 %v794_v62, %v793_v58  ;;  %v1233_v5 = vpack.c.bf16 %v810_v63, %v809_v59  ;;  %v792_v6 = vmax.f32 %v760_v0, 0.0  ;;  %v808_v7 = vmax.f32 %v776_v1, 0.0 }
 0x110   : > { %1241 = vst [vmem:[%s1516_s17 + $0x38] sm:$0xff] %v1193_v4   ;;  %1249 = vst [vmem:[%s1516_s17 + $0x78] sm:$0xff] %v1233_v5   ;;  %v1188_v8 = vpack.c.bf16 %v792_v6, %v791_v2  ;;  %v1228_v9 = vpack.c.bf16 %v808_v7, %v807_v3 }
 0x112   : > { %1240 = vst [vmem:[%s1516_s17 + $0x30] sm:$0xff] %v1188_v8   ;;  %1248 = vst [vmem:[%s1516_s17 + $0x70] sm:$0xff] %v1228_v9  }
 0x113 PF: > { %s13_s14 = sadd.s32 1, %s1408_s14   ;;  %s1571_s12 = smov %s1404_s13 }
 0x114   : > { %p10_p5 = scmp.ge.s32.totalorder %s13_s14, 4   ;;  %s1572_s13 = smov %s1574_s15 }
 0x116   :  { %12 = sbr.rel (!%p10_p5) target bundleno = 2 (0x2), region = 73 }

// kernel: bottleneck_forward.4
= control target key start
LH: loop header
LB: loop body
LE: loop exit
PB: predicated region body
PF: predicated region fallthrough
CT: control target
= control target key end

     0   :  { %s3241_s12 = smov 0   ;;  %s3774_s0 = inlined_call_operand.vmem [shape: bf16[2,4,90,128], index: 0, kind: input, shape index: {}]   ;;  %s3775_s1 = inlined_call_operand.vmem [shape: bf16[9,128,128], index: 1, kind: input, shape index: {}]   ;;  %s3776_s2 = inlined_call_operand.vmem [shape: f32[1,128], index: 2, kind: input, shape index: {}]   ;;  %s3777_s3 = inlined_call_operand.vmem [shape: bf16[2,72,128], index: 3, kind: output, shape index: {}]  }
   0x1 LB: > { %s2282_s13 = sadd.s32 4294967295, %s3217_s12   ;;  %p2286_p0 = scmp.ge.s32.totalorder %s3217_s12, 1  ;;  %s3217_s12 = sphi %s3241_s12, %s13_s12  }
   0x2   : > { %p137_p1 = scmp.lt.s32.totalorder %s3217_s12, 3 }
   0x4   : > { %p138_p2 = pnand %p2286_p0, %p137_p1 }
   0x5   : > { %p161_p3 = scmp.lt.s32.totalorder (!%p138_p2), %s2282_s13, 1 }
   0x6   : > { %141 = sbr.rel (%p138_p2) target bundleno = 426 (0x1aa), region = 32 }
   0xb   : > { %v3094_v0 = vld [vmem:[%s3775_s1 + $0x38] sm:$0xff]   ;;  %v3219_v1 = vmov 0.0   ;;  %v3096_v3 = vld [vmem:[%s3775_s1 + $0x30] sm:$0xff]   ;;  %vm3220_vm0 = vmmov 0   ;;  %v3098_v5 = vld [vmem:[%s3775_s1 + $0x28] sm:$0xff]   ;;  %s3779_s13 = smov (!%p161_p3, %s2282_s13), 1 }
   0xc   : > { %2742 = vmatprep.subr.bf16.mxu0 %v3219_v1  ;;  %2778 = vmatprep.subr.bf16.mxu1 %v3219_v1  ;;  %v3095_v2 = vld [vmem:[%s3775_s1 + $0x78] sm:$0xff]   ;;  %v3097_v4 = vld [vmem:[%s3775_s1 + $0x70] sm:$0xff]   ;;  %v3099_v6 = vld [vmem:[%s3775_s1 + $0x68] sm:$0xff]   ;;  %s3082_s30 = smul.u32 192, %s3779_s13  ;;  %vm608_vm1 = vsmask.f32 7424 }
   0xd   : > { %2743 = vmatpush3.bf16.msra.mxu0 %v3094_v0  ;;  %2758 = vmatprep.mubr.msk.bf16.mxu0 %vm3220_vm0, %v3219_v1  ;;  %v3100_v7 = vld [vmem:[%s3775_s1 + $0x20] sm:$0xff]   ;;  %v3102_v9 = vld [vmem:[%s3775_s1 + $0x18] sm:$0xff]   ;;  %v3104_v11 = vld [vmem:[%s3775_s1 + $0x10] sm:$0xff]   ;;  %vm1985_vm2 = vcmask 1046528   ;;  %s3083_s18 = smul.u32 36, %s3779_s13 }
   0xe   : > { %2779 = vmatpush3.bf16.msra.mxu1 %v3095_v2  ;;  %2744 = vmatprep.subr.bf16.mxu0 %v3219_v1  ;;  %v3101_v8 = vld [vmem:[%s3775_s1 + $0x60] sm:$0xff]   ;;  %v3103_v10 = vld [vmem:[%s3775_s1 + $0x58] sm:$0xff]   ;;  %s3298_s10 = scalar_lea.vmem %s3774_s0, %s3082_s30  ;;  %v3105_v12 = vld [vmem:[%s3775_s1 + $0x50] sm:$0xff]  }
   0xf   : > { %2780 = vmatprep.subr.bf16.mxu1 %v3219_v1  ;;  %2794 = vmatprep.mubr.msk.bf16.mxu1 %vm3220_vm0, %v3219_v1  ;;  %v3106_v13 = vld [vmem:[%s3775_s1 + $0x8] sm:$0xff]   ;;  %v3108_v15 = vld [vmem:[%s3775_s1] sm:$0xff]   ;;  %v3111_v18 = vld [vmem:[%s3298_s10 + $0x30] sm:$0xff]   ;;  %s3752_s13 = scalar_lea.vmem %s3777_s3, %s3083_s18 }
  0x10   : > { %v3107_v14 = vld [vmem:[%s3775_s1 + $0x48] sm:$0xff]   ;;  %v3109_v16 = vld [vmem:[%s3775_s1 + $0x40] sm:$0xff]   ;;  %v3112_v19 = vld [vmem:[%s3775_s1 + $0xb8] sm:$0xff]  }
  0x11   : > { %2745 = vmatpush3.bf16.msra.mxu0 %v3096_v3  ;;  %v3110_v17 = vld [vmem:[%s3298_s10] sm:$0xff]   ;;  %v3116_v20 = vld [vmem:[%s3775_s1 + $0xf8] sm:$0xff]   ;;  %v3113_v21 = vld [vmem:[%s3775_s1 + $0xb0] sm:$0xff]  }
  0x12   : > { %2781 = vmatpush3.bf16.msra.mxu1 %v3097_v4  ;;  %2746 = vmatprep.subr.bf16.mxu0 %v3219_v1  ;;  %v3114_v22 = vld [vmem:[%s3298_s10 + $0x8] sm:$0xff]   ;;  %v3118_v23 = vld [vmem:[%s3775_s1 + $0xf0] sm:$0xff]   ;;  %v3115_v24 = vld [vmem:[%s3298_s10 + $0x38] sm:$0xff]  }
  0x13   : > { %2782 = vmatprep.subr.bf16.mxu1 %v3219_v1  ;;  %v3117_v25 = vld [vmem:[%s3775_s1 + $0xa8] sm:$0xff]   ;;  %v3121_v27 = vld [vmem:[%s3775_s1 + $0xa0] sm:$0xff]   ;;  %v3119_v28 = vld [vmem:[%s3298_s10 + $0x10] sm:$0xff]  }
  0x14   : > { %v3122_v26 = vld [vmem:[%s3775_s1 + $0xe8] sm:$0xff]   ;;  %v3124_v29 = vld [vmem:[%s3775_s1 + $0xe0] sm:$0xff]   ;;  %v3123_v31 = vld [vmem:[%s3775_s1 + $0x98] sm:$0xff]  }
  0x15   : > { %2747 = vmatpush3.bf16.msra.mxu0 %v3098_v5  ;;  %v3120_v30 = vld [vmem:[%s3298_s10 + $0x40] sm:$0xff]   ;;  %v3127_v32 = vld [vmem:[%s3775_s1 + $0xd8] sm:$0xff]   ;;  %v3128_v33 = vld [vmem:[%s3775_s1 + $0x90] sm:$0xff]  }
  0x16   : > { %2783 = vmatpush3.bf16.msra.mxu1 %v3099_v6  ;;  %2748 = vmatprep.subr.bf16.mxu0 %v3219_v1  ;;  %v3125_v34 = vld [vmem:[%s3298_s10 + $0x18] sm:$0xff]   ;;  %v3129_v35 = vld [vmem:[%s3775_s1 + $0xd0] sm:$0xff]   ;;  %v3126_v36 = vld [vmem:[%s3298_s10 + $0x48] sm:$0xff]  }
  0x17   : > { %2784 = vmatprep.subr.bf16.mxu1 %v3219_v1  ;;  %v3136_v37 = vld [vmem:[%s3298_s10] sm:$0xff]   ;;  %v3130_v38 = vld [vmem:[%s3775_s1 + $0x88] sm:$0xff]   ;;  %v3132_v44 = vld [vmem:[%s3298_s10 + $0x50] ss:$0 sps:$4 sm:$0xff]  }
  0x18   : > { %v3133_v39 = vld [vmem:[%s3775_s1 + $0xc8] sm:$0xff]   ;;  %v612_v41 = vshll.u32 %v3136_v37, 16  ;;  %v3131_v42 = vld [vmem:[%s3298_s10 + $0x20] ss:$0 sps:$4 sm:$0xff]   ;;  %v610_v46 = vshrl.u32 %v3136_v37, 16  ;;  %v3141_v51 = vld [vmem:[%s3298_s10 + $0x10] sm:$0xff]  }
  0x19   : > { %2749 = vmatpush3.bf16.msra.mxu0 %v3100_v7  ;;  %v3137_v40 = vld [vmem:[%s3298_s10 + $0x8] sm:$0xff]   ;;  %v3134_v43 = vld [vmem:[%s3775_s1 + $0x80] sm:$0xff]   ;;  %v3139_v53 = vld [vmem:[%s3775_s1 + $0x138] sm:$0xff]   ;;  %v625_v56 = vshll.u32 %v3141_v51, 16  ;;  %v629_v4 = vshrl.u32 %v3141_v51, 16 }
  0x1a   : > { %2785 = vmatpush3.bf16.msra.mxu1 %v3101_v8  ;;  %2750 = vmatprep.subr.bf16.mxu0 %v3219_v1  ;;  %v3135_v45 = vld [vmem:[%s3775_s1 + $0xc0] sm:$0xff]   ;;  %v614_v47 = vrot.slane %v612_v41, 1  ;;  %v617_v48 = vshll.u32 %v3137_v40, 16  ;;  %v621_v55 = vshrl.u32 %v3137_v40, 16  ;;  %v3143_v57 = vld [vmem:[%s3775_s1 + $0x178] sm:$0xff]   ;;  %v3140_v59 = vld [vmem:[%s3775_s1 + $0x130] sm:$0xff]  }
  0x1b   : > { %2786 = vmatprep.subr.bf16.mxu1 %v3219_v1  ;;  %v3138_v52 = vld [vmem:[%s3298_s10 + $0x60] sm:$0xff]   ;;  %v3146_v58 = vld [vmem:[%s3298_s10 + $0x18] sm:$0xff]   ;;  %v627_v61 = vrot.slane %v625_v56, 1  ;;  %v3145_v62 = vld [vmem:[%s3775_s1 + $0x170] sm:$0xff]  }
  0x1c   : > { %v615_v49 = vor.u32 %v614_v47, %v610_v46  ;;  %v619_v50 = vrot.slane %v617_v48, 1  ;;  %v3142_v63 = vld [vmem:[%s3298_s10 + $0x68] sm:$0xff]   ;;  %v633_v0 = vshll.u32 %v3146_v58, 16  ;;  %v3148_v7 = vld [vmem:[%s3775_s1 + $0x120] sm:$0xff]   ;;  %v3165_v40 = vld [vmem:[%s3775_s1 + $0x1b8] sm:$0xff]  }
  0x1d   : > { %2751 = vmatpush3.bf16.msra.mxu0 %v3102_v9  ;;  %v3144_v3 = vld [vmem:[%s3775_s1 + $0x128] sm:$0xff]   ;;  %v631_v8 = vor.u32 %v629_v4, %v627_v61  ;;  %v3152_v9 = vld [vmem:[%s3298_s10 + $0x20] sm:$0x1f]   ;;  %v3173_v48 = vld [vmem:[%s3298_s10 + $0x78] sm:$0xff]  }
  0x1e   : > { %2787 = vmatpush3.bf16.msra.mxu1 %v3103_v10  ;;  %2752 = vmatprep.subr.bf16.mxu0 %v3219_v1  ;;  %v620_v54 = vsel %vm608_vm1, %v615_v49, %v619_v50  ;;  %v623_v60 = vor.u32 %v621_v55, %v619_v50  ;;  %v3149_v5 = vld [vmem:[%s3775_s1 + $0x168] sm:$0xff]   ;;  %v635_v6 = vrot.slane %v633_v0, 1  ;;  %v3151_v10 = vld [vmem:[%s3775_s1 + $0x160] sm:$0xff]   ;;  %v3171_v49 = vld [vmem:[%s3775_s1 + $0x1f0] sm:$0xff]   ;;  %v1284_v0 = vshrl.u32 %v3173_v48, 16 }
  0x1f   : > { %2788 = vmatprep.subr.bf16.mxu1 %v3219_v1  ;;  %v3167_v50 = vld [vmem:[%s3298_s10 + $0x98] sm:$0xff]   ;;  %v3170_v51 = vld [vmem:[%s3775_s1 + $0x1a8] sm:$0xff]   ;;  %v3174_v56 = vld [vmem:[%s3775_s1 + $0x1a0] sm:$0xff]  }
  0x20   : > { %v628_v2 = vsel %vm608_vm1, %v623_v60, %v627_v61  ;;  %v3175_v55 = vld [vmem:[%s3775_s1 + $0x1e8] sm:$0xff]   ;;  %v3177_v60 = vld [vmem:[%s3775_s1 + $0x1e0] sm:$0xff]   ;;  %v3181_v4 = vld [vmem:[%s3775_s1 + $0x190] sm:$0xff]  }
  0x21   : > { %2753 = vmatpush3.bf16.msra.mxu0 %v3104_v11  ;;  %v3147_v11 = vld [vmem:[%s3298_s10 + $0x70] sm:$0xff]   ;;  %v3172_v61 = vld [vmem:[%s3298_s10 + $0xa0] sm:$0xff]  }
  0x22   : > { %2789 = vmatpush3.bf16.msra.mxu1 %v3105_v12  ;;  %2754 = vmatprep.subr.bf16.mxu0 %v3219_v1  ;;  %v637_v12 = vshrl.u32 %v3146_v58, 16 }
  0x23   : > { %2790 = vmatprep.subr.bf16.mxu1 %v3219_v1 }
  0x25   : > { %2755 = vmatpush3.bf16.msra.mxu0 %v3106_v13  ;;  %v636_v13 = vsel %vm608_vm1, %v631_v8, %v635_v6  ;;  %v3178_v8 = vld [vmem:[%s3298_s10 + $0xa8] sm:$0xff]  }
  0x26   : > { %2791 = vmatpush3.bf16.msra.mxu1 %v3107_v14  ;;  %2756 = vmatprep.subr.bf16.mxu0 %v3219_v1  ;;  %v3150_v14 = vld [vmem:[%s3775_s1 + $0x118] sm:$0xff]  }
  0x27   : > { %2792 = vmatprep.subr.bf16.mxu1 %v3219_v1 }
  0x29   : > { %2757 = vmatpush3.bf16.msra.mxu0 %v3108_v15  ;;  %v641_v15 = vshll.u32 %v3152_v9, 16 }
  0x2a   : > { %2793 = vmatpush3.bf16.msra.mxu1 %v3109_v16  ;;  %2814 = vmatprep.subr.bf16.mxu0 %v3219_v1  ;;  %v3154_v16 = vld [vmem:[%s3775_s1 + $0x158] sm:$0xff]  }
  0x2b   : > { %2850 = vmatprep.subr.bf16.mxu1 %v3219_v1 }
  0x2c   : > { %2759 = vmatmul.mubr.bf16.vlgmr.msra.gmra.mxu0 %v3110_v17  ;;  %v639_v17 = vor.u32 %v637_v12, %v635_v6  ;;  %v3190_v12 = vld [vmem:[%s3298_s10 + $0x34] sm:$0xff]  }
  0x2d   : > { %2795 = vmatmul.mubr.bf16.vlgmr.msra.gmra.mxu1 %v3111_v18  ;;  %2815 = vmatpush3.bf16.msra.mxu0 %v3112_v19  ;;  %v643_v18 = vrot.slane %v641_v15, 1  ;;  %v3155_v19 = vld [vmem:[%s3775_s1 + $0x110] sm:$0xff]  }
  0x2e   : > { %2816 = vmatprep.subr.bf16.mxu0 %v3219_v1  ;;  %2762 = vmatprep.mubr.msk.bf16.mxu0 %vm3220_vm0, %v3219_v1  ;;  %v3189_v15 = vld [vmem:[%s3298_s10 + $0xc] sm:$0xff]  }
  0x2f   : > { %2798 = vmatprep.mubr.msk.bf16.mxu1 %vm3220_vm0, %v3219_v1  ;;  %2851 = vmatpush3.bf16.msra.mxu1 %v3116_v20  ;;  %v3156_v20 = vld [vmem:[%s3775_s1 + $0x150] sm:$0xff]  }
  0x30   : > { %2852 = vmatprep.subr.bf16.mxu1 %v3219_v1 }
  0x31   : > { %2817 = vmatpush3.bf16.msra.mxu0 %v3113_v21  ;;  %v3153_v21 = vld [vmem:[%s3298_s10 + $0x78] sm:$0xff]  }
  0x32   : > { %2818 = vmatprep.subr.bf16.mxu0 %v3219_v1 }
  0x33   : > { %2853 = vmatpush3.bf16.msra.mxu1 %v3118_v23  ;;  %v3157_v23 = vld [vmem:[%s3775_s1 + $0x108] sm:$0xff]  }
  0x34   : > { %2763 = vmatmul.mubr.bf16.gmra.mxu0 %v3114_v22  ;;  %2854 = vmatprep.subr.bf16.mxu1 %v3219_v1  ;;  %v644_v22 = vsel %vm608_vm1, %v639_v17, %v643_v18  ;;  %v3186_v17 = vld [vmem:[%s3775_s1 + $0x180] sm:$0xff]  }
  0x35   : > { %2799 = vmatmul.mubr.bf16.gmra.mxu1 %v3115_v24  ;;  %2819 = vmatpush3.bf16.msra.mxu0 %v3117_v25  ;;  %v3163_v24 = vld [vmem:[%s3298_s10 + $0x60] sm:$0xff]   ;;  %v3159_v25 = vld [vmem:[%s3775_s1 + $0x148] sm:$0xff]  }
  0x36   : > { %2766 = vmatprep.mubr.msk.bf16.mxu0 %vm3220_vm0, %v3219_v1  ;;  %2802 = vmatprep.mubr.msk.bf16.mxu1 %vm3220_vm0, %v3219_v1 }
  0x37   : > { %2820 = vmatprep.subr.bf16.mxu0 %v3219_v1  ;;  %2855 = vmatpush3.bf16.msra.mxu1 %v3122_v26  ;;  %v645_v26 = vshrl.u32 %v3152_v9, 16  ;;  %v3188_v9 = vld [vmem:[%s3298_s10 + $0x4] sm:$0xff]  }
  0x38   : > { %2856 = vmatprep.subr.bf16.mxu1 %v3219_v1 }
  0x39   : > { %2821 = vmatpush3.bf16.msra.mxu0 %v3121_v27  ;;  %v3160_v27 = vld [vmem:[%s3775_s1 + $0x100] sm:$0xff]  }
  0x3a   : > { %2822 = vmatprep.subr.bf16.mxu0 %v3219_v1 }
  0x3b   : > { %2857 = vmatpush3.bf16.msra.mxu1 %v3124_v29  ;;  %v1259_v29 = vshll.u32 %v3163_v24, 16 }
  0x3c   : > { %2767 = vmatmul.mubr.bf16.gmra.mxu0 %v3119_v28  ;;  %2858 = vmatprep.subr.bf16.mxu1 %v3219_v1  ;;  %v3164_v28 = vld [vmem:[%s3298_s10 + $0x68] sm:$0xff]  }
  0x3d   : > { %2803 = vmatmul.mubr.bf16.gmra.mxu1 %v3120_v30  ;;  %2823 = vmatpush3.bf16.msra.mxu0 %v3123_v31  ;;  %v3161_v30 = vld [vmem:[%s3775_s1 + $0x140] sm:$0xff]   ;;  %v647_v31 = vor.u32 %v645_v26, %v643_v18  ;;  %v1743_v26 = vshrl.u32 %v3190_v12, 16 }
  0x3e   : > { %2770 = vmatprep.mubr.msk.bf16.mxu0 %vm3220_vm0, %v3219_v1  ;;  %2806 = vmatprep.mubr.msk.bf16.mxu1 %vm3220_vm0, %v3219_v1  ;;  %v3191_v18 = vld [vmem:[%s3298_s10 + $0x3c] sm:$0xff]  }
  0x3f   : > { %2824 = vmatprep.subr.bf16.mxu0 %v3219_v1  ;;  %2859 = vmatpush3.bf16.msra.mxu1 %v3127_v32  ;;  %v3158_v32 = vld [vmem:[%s3298_s10 + $0x80] ss:$0 sps:$4 sm:$0xff]  }
  0x40   : > { %2860 = vmatprep.subr.bf16.mxu1 %v3219_v1 }
  0x41   : > { %2825 = vmatpush3.bf16.msra.mxu0 %v3128_v33  ;;  %v1257_v33 = vshrl.u32 %v3163_v24, 16 }
  0x42   : > { %2826 = vmatprep.subr.bf16.mxu0 %v3219_v1 }
  0x43   : > { %2861 = vmatpush3.bf16.msra.mxu1 %v3129_v35  ;;  %v1264_v35 = vshll.u32 %v3164_v28, 16 }
  0x44   : > { %2771 = vmatmul.mubr.bf16.gmra.mxu0 %v3125_v34  ;;  %2862 = vmatprep.subr.bf16.mxu1 %v3219_v1  ;;  %v1261_v34 = vrot.slane %v1259_v29, 1 }
  0x45   : > { %2807 = vmatmul.mubr.bf16.gmra.mxu1 %v3126_v36  ;;  %2774 = vmatprep.mubr.msk.bf16.mxu0 %vm3220_vm0, %v3219_v1  ;;  %v1266_v37 = vrot.slane %v1264_v35, 1 }
  0x46   : > { %2810 = vmatprep.mubr.msk.bf16.mxu1 %vm3220_vm0, %v3219_v1  ;;  %2827 = vmatpush3.bf16.msra.mxu0 %v3130_v38  ;;  %v1262_v36 = vor.u32 %v1261_v34, %v1257_v33  ;;  %v3168_v38 = vld [vmem:[%s3298_s10 + $0x70] sm:$0xff]   ;;  %v3195_v34 = vld [vmem:[%s3298_s10 + $0x44] sm:$0xff]  }
  0x47   : > { %2863 = vmatpush3.bf16.msra.mxu1 %v3133_v39  ;;  %2828 = vmatprep.subr.bf16.mxu0 %v3219_v1  ;;  %v3162_v39 = vld [vmem:[%s3298_s10 + $0x90] sm:$0xff]  }
  0x48   : > { %2864 = vmatprep.subr.bf16.mxu1 %v3219_v1  ;;  %v1267_v41 = vsel %vm608_vm1, %v1262_v36, %v1266_v37  ;;  %v3192_v36 = vld [vmem:[%s3775_s1 + $0x238] sm:$0xff]  }
  0x4a   : > { %2829 = vmatpush3.bf16.msra.mxu0 %v3134_v43  ;;  %v1272_v43 = vshll.u32 %v3168_v38, 16 }
  0x4b   : > { %2865 = vmatpush3.bf16.msra.mxu1 %v3135_v45  ;;  %2886 = vmatprep.subr.bf16.mxu0 %v3219_v1  ;;  %v3166_v45 = vld [vmem:[%s3775_s1 + $0x1b0] sm:$0xff]  }
  0x4c   : > { %2775 = vmatmul.mubr.bf16.gmra.mxu0 %v3131_v42  ;;  %2922 = vmatprep.subr.bf16.mxu1 %v3219_v1  ;;  %v1268_v42 = vshrl.u32 %v3164_v28, 16  ;;  %v1274_v47 = vrot.slane %v1272_v43, 1  ;;  %v1750_v28 = vshll.u32 %v3191_v18, 16 }
  0x4d   : > { %2811 = vmatmul.mubr.bf16.gmra.mxu1 %v3132_v44  ;;  %2830 = vmatprep.mubr.msk.bf16.mxu0 %vm3220_vm0, %v3219_v1  ;;  %v3169_v44 = vld [vmem:[%s3775_s1 + $0x1f8] sm:$0xff]  }
  0x4e   : > { %2866 = vmatprep.mubr.msk.bf16.mxu1 %vm3220_vm0, %v3219_v1  ;;  %v1270_v46 = vor.u32 %v1268_v42, %v1266_v37  ;;  %v1752_v33 = vrot.slane %v1750_v28, 1  ;;  %v1511_v37 = vshrl.u32 %v3189_v15, 16  ;;  %v3193_v42 = vld [vmem:[%s3775_s1 + $0x230] sm:$0xff]  }
  0x54   : > { %2831 = vmatmul.mubr.bf16.vlgmr.msra.gmra.mxu0 %v620_v54  ;;  %v1280_v54 = vshll.u32 %v3173_v48, 16  ;;  %v3198_v48 = vld [vmem:[%s3298_s10 + $0x4c] sm:$0xff]  }
  0x55   : > { %2867 = vmatmul.mubr.bf16.vlgmr.msra.gmra.mxu1 %v3138_v52  ;;  %2887 = vmatpush3.bf16.msra.mxu0 %v3139_v53  ;;  %v1275_v52 = vsel %vm608_vm1, %v1270_v46, %v1274_v47  ;;  %v1276_v53 = vshrl.u32 %v3168_v38, 16 }
  0x56   : > { %2888 = vmatprep.subr.bf16.mxu0 %v3219_v1  ;;  %2834 = vmatprep.mubr.msk.bf16.mxu0 %vm3220_vm0, %v3219_v1  ;;  %v1282_v58 = vrot.slane %v1280_v54, 1  ;;  %v1762_v54 = vshrl.u32 %v3195_v34, 16 }
  0x57   : > { %2870 = vmatprep.mubr.msk.bf16.mxu1 %vm3220_vm0, %v3219_v1  ;;  %2923 = vmatpush3.bf16.msra.mxu1 %v3143_v57  ;;  %v1278_v57 = vor.u32 %v1276_v53, %v1274_v47 }
  0x58   : > { %2924 = vmatprep.subr.bf16.mxu1 %v3219_v1 }
  0x59   : > { %2889 = vmatpush3.bf16.msra.mxu0 %v3140_v59  ;;  %v3179_v59 = vld [vmem:[%s3298_s10 + $0x80] sm:$0x1f]  }
  0x5a   : > { %2890 = vmatprep.subr.bf16.mxu0 %v3219_v1 }
  0x5b   : > { %2925 = vmatpush3.bf16.msra.mxu1 %v3145_v62  ;;  %v3176_v62 = vld [vmem:[%s3775_s1 + $0x198] sm:$0xff]  }
  0x5c   : > { %2835 = vmatmul.mubr.bf16.gmra.mxu0 %v628_v2  ;;  %2926 = vmatprep.subr.bf16.mxu1 %v3219_v1  ;;  %v1288_v2 = vshll.u32 %v3179_v59, 16 }
  0x5d   : > { %2871 = vmatmul.mubr.bf16.gmra.mxu1 %v3142_v63  ;;  %2891 = vmatpush3.bf16.msra.mxu0 %v3144_v3  ;;  %v1283_v63 = vsel %vm608_vm1, %v1278_v57, %v1282_v58  ;;  %v3180_v3 = vld [vmem:[%s3775_s1 + $0x1d8] sm:$0xff]  }
  0x5e   : > { %2838 = vmatprep.mubr.msk.bf16.mxu0 %vm3220_vm0, %v3219_v1  ;;  %2874 = vmatprep.mubr.msk.bf16.mxu1 %vm3220_vm0, %v3219_v1  ;;  %v1290_v6 = vrot.slane %v1288_v2, 1 }
  0x5f   : > { %2892 = vmatprep.subr.bf16.mxu0 %v3219_v1  ;;  %2927 = vmatpush3.bf16.msra.mxu1 %v3149_v5  ;;  %v1286_v5 = vor.u32 %v1284_v0, %v1282_v58  ;;  %v3199_v58 = vld [vmem:[%s3775_s1 + $0x220] sm:$0xff]   ;;  %v3200_v0 = vld [vmem:[%s3775_s1 + $0x218] sm:$0xff]  }
  0x60   : > { %2928 = vmatprep.subr.bf16.mxu1 %v3219_v1 }
  0x61   : > { %2893 = vmatpush3.bf16.msra.mxu0 %v3148_v7  ;;  %v3182_v7 = vld [vmem:[%s3775_s1 + $0x1d0] sm:$0xff]  }
  0x62   : > { %2894 = vmatprep.subr.bf16.mxu0 %v3219_v1 }
  0x63   : > { %2929 = vmatpush3.bf16.msra.mxu1 %v3151_v10  ;;  %v1291_v10 = vsel %vm608_vm1, %v1286_v5, %v1290_v6  ;;  %v1770_v5 = vshrl.u32 %v3198_v48, 16 }
  0x64   : > { %2839 = vmatmul.mubr.bf16.gmra.mxu0 %v636_v13  ;;  %2930 = vmatprep.subr.bf16.mxu1 %v3219_v1  ;;  %v3185_v13 = vld [vmem:[%s3775_s1 + $0x1c8] sm:$0xff]  }
  0x65   : > { %2875 = vmatmul.mubr.bf16.gmra.mxu1 %v3147_v11  ;;  %2895 = vmatpush3.bf16.msra.mxu0 %v3150_v14  ;;  %v3183_v11 = vld [vmem:[%s3775_s1 + $0x188] sm:$0xff]   ;;  %v1292_v14 = vshrl.u32 %v3179_v59, 16 }
  0x66   : > { %2842 = vmatprep.mubr.msk.bf16.mxu0 %vm3220_vm0, %v3219_v1  ;;  %2878 = vmatprep.mubr.msk.bf16.mxu1 %vm3220_vm0, %v3219_v1  ;;  %v3201_v59 = vld [vmem:[%s3298_s10 + $0x24] sm:$0x1f]  }
  0x67   : > { %2896 = vmatprep.subr.bf16.mxu0 %v3219_v1  ;;  %2931 = vmatpush3.bf16.msra.mxu1 %v3154_v16  ;;  %v1502_v16 = vshll.u32 %v3188_v9, 16 }
  0x68   : > { %2932 = vmatprep.subr.bf16.mxu1 %v3219_v1 }
  0x69   : > { %2897 = vmatpush3.bf16.msra.mxu0 %v3155_v19  ;;  %v1745_v19 = vshll.u32 %v3190_v12, 16  ;;  %v1504_v24 = vrot.slane %v1502_v16, 1 }
  0x6a   : > { %2898 = vmatprep.subr.bf16.mxu0 %v3219_v1 }
  0x6b   : > { %2933 = vmatpush3.bf16.msra.mxu1 %v3156_v20  ;;  %v3187_v20 = vld [vmem:[%s3775_s1 + $0x1c0] sm:$0xff]  }
  0x6c   : > { %2843 = vmatmul.mubr.bf16.gmra.mxu0 %v644_v22  ;;  %2934 = vmatprep.subr.bf16.mxu1 %v3219_v1  ;;  %v1294_v22 = vor.u32 %v1292_v14, %v1290_v6  ;;  %v3204_v14 = vld [vmem:[%s3775_s1 + $0x208] sm:$0xff]  }
  0x6d   : > { %2879 = vmatmul.mubr.bf16.gmra.mxu1 %v3153_v21  ;;  %2846 = vmatprep.mubr.msk.bf16.mxu0 %vm3220_vm0, %v3219_v1  ;;  %v3184_v21 = vld [vmem:[%s3298_s10 + $0xb0] ss:$0 sps:$4 sm:$0xff]  }
  0x6e   : > { %2882 = vmatprep.mubr.msk.bf16.mxu1 %vm3220_vm0, %v3219_v1  ;;  %2899 = vmatpush3.bf16.msra.mxu0 %v3157_v23  ;;  %v1500_v23 = vshrl.u32 %v3188_v9, 16  ;;  %v3203_v9 = vld [vmem:[%s3775_s1 + $0x210] sm:$0xff]  }
  0x6f   : > { %2935 = vmatpush3.bf16.msra.mxu1 %v3159_v25  ;;  %2900 = vmatprep.subr.bf16.mxu0 %v3219_v1  ;;  %v1507_v25 = vshll.u32 %v3189_v15, 16  ;;  %v1535_v15 = vshrl.u32 %v3201_v59, 16 }
  0x70   : > { %2936 = vmatprep.subr.bf16.mxu1 %v3219_v1  ;;  %v1505_v29 = vor.u32 %v1504_v24, %v1500_v23  ;;  %v3209_v23 = vld [vmem:[%s3298_s10 + $0x24] sm:$0x1f]  }
  0x72   : > { %2901 = vmatpush3.bf16.msra.mxu0 %v3160_v27  ;;  %v1747_v27 = vrot.slane %v1745_v19, 1 }
  0x73   : > { %2937 = vmatpush3.bf16.msra.mxu1 %v3161_v30  ;;  %2958 = vmatprep.subr.bf16.mxu0 %v3219_v1  ;;  %v1509_v30 = vrot.slane %v1507_v25, 1 }
  0x74   : > { %2847 = vmatmul.mubr.bf16.gmra.mxu0 %v647_v31  ;;  %2994 = vmatprep.subr.bf16.mxu1 %v3219_v1  ;;  %v3194_v31 = vld [vmem:[%s3298_s10 + $0x14] sm:$0xff]  }
  0x75   : > { %2883 = vmatmul.mubr.bf16.gmra.mxu1 %v3158_v32  ;;  %2902 = vmatprep.mubr.msk.bf16.mxu0 %vm3220_vm0, %v3219_v1  ;;  %v1748_v32 = vor.u32 %v1747_v27, %v1743_v26  ;;  %v1510_v35 = vsel %vm608_vm1, %v1505_v29, %v1509_v30  ;;  %v1515_v38 = vshll.u32 %v3194_v31, 16  ;;  %v1513_v43 = vor.u32 %v1511_v37, %v1509_v30  ;;  %v3210_v29 = vld [vmem:[%s3298_s10 + $0x14] sm:$0xff]  }
  0x76   : > { %2938 = vmatprep.mubr.msk.bf16.mxu1 %vm3220_vm0, %v3219_v1  ;;  %v1993_v27 = vrot.slane %v3209_v23, 1 }
  0x7c   : > { %2903 = vmatmul.mubr.bf16.vlgmr.msra.gmra.mxu0 %v3162_v39  ;;  %v1753_v39 = vsel %vm608_vm1, %v1748_v32, %v1752_v33 }
  0x7d   : > { %2939 = vmatmul.mubr.bf16.vlgmr.msra.gmra.mxu1 %v1267_v41  ;;  %2959 = vmatpush3.bf16.msra.mxu0 %v3165_v40  ;;  %v1754_v40 = vshrl.u32 %v3191_v18, 16  ;;  %v1758_v41 = vshll.u32 %v3195_v34, 16 }
  0x7e   : > { %2960 = vmatprep.subr.bf16.mxu0 %v3219_v1  ;;  %2906 = vmatprep.mubr.msk.bf16.mxu0 %vm3220_vm0, %v3219_v1 }
  0x7f   : > { %2942 = vmatprep.mubr.msk.bf16.mxu1 %vm3220_vm0, %v3219_v1  ;;  %2995 = vmatpush3.bf16.msra.mxu1 %v3169_v44  ;;  %v1517_v44 = vrot.slane %v1515_v38, 1  ;;  %v1756_v46 = vor.u32 %v1754_v40, %v1752_v33  ;;  %v1760_v47 = vrot.slane %v1758_v41, 1 }
  0x80   : > { %2996 = vmatprep.subr.bf16.mxu1 %v3219_v1 }
  0x81   : > { %2961 = vmatpush3.bf16.msra.mxu0 %v3166_v45  ;;  %v3197_v45 = vld [vmem:[%s3298_s10 + $0x1c] sm:$0xff]   ;;  %v1761_v53 = vsel %vm608_vm1, %v1756_v46, %v1760_v47 }
  0x82   : > { %2962 = vmatprep.subr.bf16.mxu0 %v3219_v1  ;;  %v1527_v2 = vshrl.u32 %v3197_v45, 16 }
  0x83   : > { %2997 = vmatpush3.bf16.msra.mxu1 %v3171_v49  ;;  %v1518_v49 = vsel %vm608_vm1, %v1513_v43, %v1517_v44 }
  0x84   : > { %2907 = vmatmul.mubr.bf16.gmra.mxu0 %v3167_v50  ;;  %2998 = vmatprep.subr.bf16.mxu1 %v3219_v1  ;;  %v3196_v50 = vld [vmem:[%s3775_s1 + $0x228] sm:$0xff]  }
  0x85   : > { %2943 = vmatmul.mubr.bf16.gmra.mxu1 %v1275_v52  ;;  %2963 = vmatpush3.bf16.msra.mxu0 %v3170_v51  ;;  %v1519_v51 = vshrl.u32 %v3194_v31, 16  ;;  %v1523_v52 = vshll.u32 %v3197_v45, 16  ;;  %v1989_v31 = vrot.slane %v3210_v29, 1 }
  0x86   : > { %2910 = vmatprep.mubr.msk.bf16.mxu0 %vm3220_vm0, %v3219_v1  ;;  %2946 = vmatprep.mubr.msk.bf16.mxu1 %vm3220_vm0, %v3219_v1 }
  0x87   : > { %2964 = vmatprep.subr.bf16.mxu0 %v3219_v1  ;;  %2999 = vmatpush3.bf16.msra.mxu1 %v3175_v55  ;;  %v1766_v55 = vshll.u32 %v3198_v48, 16  ;;  %v1525_v57 = vrot.slane %v1523_v52, 1 }
  0x88   : > { %3000 = vmatprep.subr.bf16.mxu1 %v3219_v1 }
  0x89   : > { %2965 = vmatpush3.bf16.msra.mxu0 %v3174_v56  ;;  %v1521_v56 = vor.u32 %v1519_v51, %v1517_v44 }
  0x8a   : > { %2966 = vmatprep.subr.bf16.mxu0 %v3219_v1 }
  0x8b   : > { %3001 = vmatpush3.bf16.msra.mxu1 %v3177_v60  ;;  %v1764_v60 = vor.u32 %v1762_v54, %v1760_v47 }
  0x8c   : > { %2911 = vmatmul.mubr.bf16.gmra.mxu0 %v3172_v61  ;;  %3002 = vmatprep.subr.bf16.mxu1 %v3219_v1  ;;  %v1768_v61 = vrot.slane %v1766_v55, 1 }
  0x8d   : > { %2947 = vmatmul.mubr.bf16.gmra.mxu1 %v1283_v63  ;;  %2967 = vmatpush3.bf16.msra.mxu0 %v3176_v62  ;;  %v3202_v62 = vld [vmem:[%s3298_s10 + $0x54] sm:$0x1f]   ;;  %v1526_v63 = vsel %vm608_vm1, %v1521_v56, %v1525_v57 }
  0x8e   : > { %2914 = vmatprep.mubr.msk.bf16.mxu0 %vm3220_vm0, %v3219_v1  ;;  %2950 = vmatprep.mubr.msk.bf16.mxu1 %vm3220_vm0, %v3219_v1  ;;  %v1774_v6 = vshll.u32 %v3202_v62, 16  ;;  %v1778_v16 = vshrl.u32 %v3202_v62, 16 }
  0x8f   : > { %2968 = vmatprep.subr.bf16.mxu0 %v3219_v1  ;;  %3003 = vmatpush3.bf16.msra.mxu1 %v3180_v3  ;;  %v1531_v3 = vshll.u32 %v3201_v59, 16 }
  0x90   : > { %3004 = vmatprep.subr.bf16.mxu1 %v3219_v1 }
  0x91   : > { %2969 = vmatpush3.bf16.msra.mxu0 %v3181_v4  ;;  %v1769_v4 = vsel %vm608_vm1, %v1764_v60, %v1768_v61 }
  0x92   : > { %2970 = vmatprep.subr.bf16.mxu0 %v3219_v1 }
  0x93   : > { %3005 = vmatpush3.bf16.msra.mxu1 %v3182_v7  ;;  %v1529_v7 = vor.u32 %v1527_v2, %v1525_v57 }
  0x94   : > { %2915 = vmatmul.mubr.bf16.gmra.mxu0 %v3178_v8  ;;  %3006 = vmatprep.subr.bf16.mxu1 %v3219_v1  ;;  %v1533_v8 = vrot.slane %v1531_v3, 1 }
  0x95   : > { %2951 = vmatmul.mubr.bf16.gmra.mxu1 %v1291_v10  ;;  %2918 = vmatprep.mubr.msk.bf16.mxu0 %vm3220_vm0, %v3219_v1  ;;  %v1772_v10 = vor.u32 %v1770_v5, %v1768_v61 }
  0x96   : > { %2954 = vmatprep.mubr.msk.bf16.mxu1 %vm3220_vm0, %v3219_v1  ;;  %2971 = vmatpush3.bf16.msra.mxu0 %v3183_v11  ;;  %v1776_v11 = vrot.slane %v1774_v6, 1  ;;  %v1534_v12 = vsel %vm608_vm1, %v1529_v7, %v1533_v8  ;;  %v1537_v18 = vor.u32 %v1535_v15, %v1533_v8 }
  0x97   : > { %3007 = vmatpush3.bf16.msra.mxu1 %v3185_v13  ;;  %2972 = vmatprep.subr.bf16.mxu0 %v3219_v1 }
  0x98   : > { %3008 = vmatprep.subr.bf16.mxu1 %v3219_v1  ;;  %v1777_v13 = vsel %vm608_vm1, %v1772_v10, %v1776_v11  ;;  %v1780_v19 = vor.u32 %v1778_v16, %v1776_v11 }
  0x9a   : > { %2973 = vmatpush3.bf16.msra.mxu0 %v3186_v17  ;;  %v3205_v17 = vld [vmem:[%s3775_s1 + $0x200] sm:$0xff]  }
  0x9b   : > { %3009 = vmatpush3.bf16.msra.mxu1 %v3187_v20  ;;  %3030 = vmatprep.subr.bf16.mxu0 %v3219_v1  ;;  %v3206_v20 = vld [vmem:[%s3298_s10 + $0x4] sm:$0xfe]  }
  0x9c   : > { %2919 = vmatmul.mubr.bf16.gmra.mxu0 %v3184_v21  ;;  %3066 = vmatprep.subr.bf16.mxu1 %v3219_v1  ;;  %v3207_v21 = vld [vmem:[%s3298_s10 + $0xc] sm:$0xff]   ;;  %v1986_v24 = vrot.slane %v3206_v20, 1 }
  0x9d   : > { %2955 = vmatmul.mubr.bf16.gmra.mxu1 %v1294_v22  ;;  %2974 = vmatprep.mubr.msk.bf16.mxu0 %vm3220_vm0, %v3219_v1  ;;  %v3208_v22 = vld [vmem:[%s3298_s10 + $0x1c] sm:$0xff]   ;;  %v1987_v25 = vrot.slane %v3207_v21, 1 }
  0x9e   : > { %3010 = vmatprep.mubr.msk.bf16.mxu1 %vm3220_vm0, %v3219_v1  ;;  %v1991_v26 = vrot.slane %v3208_v22, 1 }
  0x9f   : > { %v1988_v28 = vsel %vm1985_vm2, %v1986_v24, %v1987_v25  ;;  %v1990_v32 = vsel %vm1985_vm2, %v1987_v25, %v1989_v31 }
  0xa0   : > { %v1994_v30 = vsel %vm1985_vm2, %v1991_v26, %v1993_v27  ;;  %v1992_v33 = vsel %vm1985_vm2, %v1989_v31, %v1991_v26 }
  0xa4   : > { %2975 = vmatmul.mubr.bf16.vlgmr.msra.gmra.mxu0 %v1510_v35 }
  0xa5   : > { %3011 = vmatmul.mubr.bf16.vlgmr.msra.gmra.mxu1 %v1753_v39  ;;  %3031 = vmatpush3.bf16.msra.mxu0 %v3192_v36 }
  0xa6   : > { %3032 = vmatprep.subr.bf16.mxu0 %v3219_v1  ;;  %2978 = vmatprep.mubr.msk.bf16.mxu0 %vm3220_vm0, %v3219_v1 }
  0xa7   : > { %3014 = vmatprep.mubr.msk.bf16.mxu1 %vm3220_vm0, %v3219_v1  ;;  %3074 = vmatpush3.bf16.msra.mxu1 %v3192_v36 }
  0xa8   : > { %3067 = vmatprep.subr.bf16.mxu1 %v3219_v1 }
  0xa9   : > { %3033 = vmatpush3.bf16.msra.mxu0 %v3193_v42 }
  0xaa   : > { %3034 = vmatprep.subr.bf16.mxu0 %v3219_v1 }
  0xab   : > { %3075 = vmatpush3.bf16.msra.mxu1 %v3193_v42 }
  0xac   : > { %2979 = vmatmul.mubr.bf16.gmra.mxu0 %v1518_v49  ;;  %3068 = vmatprep.subr.bf16.mxu1 %v3219_v1 }
  0xad   : > { %3015 = vmatmul.mubr.bf16.gmra.mxu1 %v1761_v53  ;;  %3035 = vmatpush3.bf16.msra.mxu0 %v3196_v50 }
  0xae   : > { %2982 = vmatprep.mubr.msk.bf16.mxu0 %vm3220_vm0, %v3219_v1  ;;  %3018 = vmatprep.mubr.msk.bf16.mxu1 %vm3220_vm0, %v3219_v1 }
  0xaf   : > { %3036 = vmatprep.subr.bf16.mxu0 %v3219_v1  ;;  %3076 = vmatpush3.bf16.msra.mxu1 %v3196_v50 }
  0xb0   : > { %3069 = vmatprep.subr.bf16.mxu1 %v3219_v1 }
  0xb1   : > { %3037 = vmatpush3.bf16.msra.mxu0 %v3199_v58 }
  0xb2   : > { %3038 = vmatprep.subr.bf16.mxu0 %v3219_v1 }
  0xb3   : > { %3077 = vmatpush3.bf16.msra.mxu1 %v3199_v58 }
  0xb4   : > { %2983 = vmatmul.mubr.bf16.gmra.mxu0 %v1526_v63  ;;  %3070 = vmatprep.subr.bf16.mxu1 %v3219_v1 }
  0xb5   : > { %3019 = vmatmul.mubr.bf16.gmra.mxu1 %v1769_v4  ;;  %3039 = vmatpush3.bf16.msra.mxu0 %v3200_v0 }
  0xb6   : > { %2986 = vmatprep.mubr.msk.bf16.mxu0 %vm3220_vm0, %v3219_v1  ;;  %3022 = vmatprep.mubr.msk.bf16.mxu1 %vm3220_vm0, %v3219_v1 }
  0xb7   : > { %3078 = vmatpush3.bf16.msra.mxu1 %v3200_v0  ;;  %3040 = vmatprep.subr.bf16.mxu0 %v3219_v1 }
  0xb8   : > { %3071 = vmatprep.subr.bf16.mxu1 %v3219_v1 }
  0xb9   : > { %3041 = vmatpush3.bf16.msra.mxu0 %v3203_v9 }
  0xba   : > { %3042 = vmatprep.subr.bf16.mxu0 %v3219_v1 }
  0xbb   : > { %3079 = vmatpush3.bf16.msra.mxu1 %v3203_v9 }
  0xbc   : > { %2987 = vmatmul.mubr.bf16.gmra.mxu0 %v1534_v12  ;;  %3072 = vmatprep.subr.bf16.mxu1 %v3219_v1 }
  0xbd   : > { %3023 = vmatmul.mubr.bf16.gmra.mxu1 %v1777_v13  ;;  %2990 = vmatprep.mubr.msk.bf16.mxu0 %vm3220_vm0, %v3219_v1 }
  0xbe   : > { %3026 = vmatprep.mubr.msk.bf16.mxu1 %vm3220_vm0, %v3219_v1  ;;  %3043 = vmatpush3.bf16.msra.mxu0 %v3204_v14 }
  0xbf   : > { %3080 = vmatpush3.bf16.msra.mxu1 %v3204_v14  ;;  %3044 = vmatprep.subr.bf16.mxu0 %v3219_v1 }
  0xc0   : > { %3073 = vmatprep.subr.bf16.mxu1 %v3219_v1 }
  0xc2   : > { %3045 = vmatpush3.bf16.msra.mxu0 %v3205_v17 }
  0xc3   : > { %3081 = vmatpush3.bf16.msra.mxu1 %v3205_v17 }
  0xc4   : > { %2991 = vmatmul.mubr.bf16.gmra.mxu0 %v1537_v18 }
  0xc5   : > { %3027 = vmatmul.mubr.bf16.gmra.mxu1 %v1780_v19  ;;  %3046 = vmatprep.mubr.msk.bf16.mxu0 %vm3220_vm0, %v3219_v1 }
  0xc6   : > { %3058 = vmatprep.mubr.msk.bf16.mxu1 %vm3220_vm0, %v3219_v1 }
  0xcc   : > { %3047 = vmatmul.mubr.bf16.vlgmr.msra.gmra.mxu0 %v1988_v28 }
  0xcd   : > { %3059 = vmatmul.mubr.bf16.vlgmr.msra.gmra.mxu1 %v1994_v30  ;;  %3050 = vmatprep.mubr.msk.bf16.mxu0 %vm3220_vm0, %v3219_v1 }
  0xce   : > { %3062 = vmatprep.mubr.msk.bf16.mxu1 %vm3220_vm0, %v3219_v1 }
  0xd4   : > { %3051 = vmatmul.mubr.bf16.gmra.mxu0 %v1990_v32 }
  0xd5   : > { %3063 = vmatmul.mubr.bf16.gmra.mxu1 %v1993_v27  ;;  %3054 = vmatprep.mubr.msk.bf16.mxu0 %vm3220_vm0, %v3219_v1 }
  0xdc   : > { %3055 = vmatmul.mubr.bf16.gmra.mxu0 %v1992_v33 }
  0xec   : > { %v307_v34 = vpop.f32.mrf.mxu0 }
  0xed   : > { %v491_v35 = vpop.f32.mrf.mxu1 }
  0xee   : > { %v538_v36 = vadd.f32 %v491_v35, %v307_v34  ;;  %v2760_v37 = vpop.f32.mrf.mxu0 }
  0xef   : > { %v2796_v38 = vpop.f32.mrf.mxu1 }
  0xf0   : > { %v310_v39 = vpop.f32.mrf.mxu0 }
  0xf1   : > { %v494_v40 = vpop.f32.mrf.mxu1 }
  0xf2   : > { %v539_v41 = vadd.f32 %v494_v40, %v310_v39  ;;  %v2761_v42 = vpop.f32.mrf.mxu0 }
  0xf3   : > { %v2797_v43 = vpop.f32.mrf.mxu1 }
  0xf4   : > { %v315_v44 = vpop.f32.mrf.mxu0 }
  0xf5   : > { %v499_v45 = vpop.f32.mrf.mxu1 }
  0xf6   : > { %v540_v46 = vadd.f32 %v499_v45, %v315_v44  ;;  %v2764_v47 = vpop.f32.mrf.mxu0 }
  0xf7   : > { %v2800_v48 = vpop.f32.mrf.mxu1 }
  0xf8   : > { %v318_v49 = vpop.f32.mrf.mxu0 }
  0xf9   : > { %v502_v50 = vpop.f32.mrf.mxu1 }
  0xfa   : > { %v541_v1 = vadd.f32 %v502_v50, %v318_v49  ;;  %v2765_v51 = vpop.f32.mrf.mxu0 }
  0xfb   : > { %v2801_v52 = vpop.f32.mrf.mxu1 }
  0xfc   : > { %v323_v53 = vpop.f32.mrf.mxu0 }
  0xfd   : > { %v507_v54 = vpop.f32.mrf.mxu1 }
  0xfe   : > { %v542_v55 = vadd.f32 %v507_v54, %v323_v53  ;;  %v2768_v56 = vpop.f32.mrf.mxu0 }
  0xff   : > { %v2804_v57 = vpop.f32.mrf.mxu1 }
 0x100   : > { %v326_v58 = vpop.f32.mrf.mxu0 }
 0x101   : > { %v510_v59 = vpop.f32.mrf.mxu1 }
 0x102   : > { %v543_v60 = vadd.f32 %v510_v59, %v326_v58  ;;  %v2769_v61 = vpop.f32.mrf.mxu0 }
 0x103   : > { %v2805_v62 = vpop.f32.mrf.mxu1 }
 0x104   : > { %v331_v63 = vpop.f32.mrf.mxu0 }
 0x105   : > { %v515_v0 = vpop.f32.mrf.mxu1 }
 0x106   : > { %v544_v2 = vadd.f32 %v515_v0, %v331_v63  ;;  %v2772_v3 = vpop.f32.mrf.mxu0 }
 0x107   : > { %v2808_v4 = vpop.f32.mrf.mxu1 }
 0x108   : > { %v334_v5 = vpop.f32.mrf.mxu0 }
 0x109   : > { %v518_v6 = vpop.f32.mrf.mxu1 }
 0x10a   : > { %v545_v7 = vadd.f32 %v518_v6, %v334_v5  ;;  %v2773_v8 = vpop.f32.mrf.mxu0 }
 0x10b   : > { %v2809_v9 = vpop.f32.mrf.mxu1 }
 0x10c   : > { %v339_v10 = vpop.f32.mrf.mxu0 }
 0x10d   : > { %v523_v11 = vpop.f32.mrf.mxu1 }
 0x10e   : > { %v546_v12 = vadd.f32 %v523_v11, %v339_v10  ;;  %v2776_v13 = vpop.f32.mrf.mxu0 }
 0x10f   : > { %v2812_v14 = vpop.f32.mrf.mxu1 }
 0x110   : > { %v342_v15 = vpop.f32.mrf.mxu0 }
 0x111   : > { %v526_v16 = vpop.f32.mrf.mxu1 }
 0x112   : > { %v2777_v17 = vpop.f32.mrf.mxu0 }
 0x113   : > { %v2813_v18 = vpop.f32.mrf.mxu1 }
 0x114   : > { %v735_v19 = vpop.f32.mrf.mxu0 }
 0x115   : > { %v782_v20 = vadd.f32 %v735_v19, %v538_v36  ;;  %v937_v21 = vpop.f32.mrf.mxu1 }
 0x116   : > { %v2832_v22 = vpop.f32.mrf.mxu0 }
 0x117   : > { %v984_v23 = vadd.f32 %v937_v21, %v782_v20  ;;  %v2868_v24 = vpop.f32.mrf.mxu1 }
 0x118   : > { %v738_v25 = vpop.f32.mrf.mxu0 }
 0x119   : > { %v783_v26 = vadd.f32 %v738_v25, %v539_v41  ;;  %v940_v27 = vpop.f32.mrf.mxu1 }
 0x11a   : > { %v2833_v28 = vpop.f32.mrf.mxu0 }
 0x11b   : > { %v985_v29 = vadd.f32 %v940_v27, %v783_v26  ;;  %v2869_v30 = vpop.f32.mrf.mxu1 }
 0x11c   : > { %v743_v31 = vpop.f32.mrf.mxu0 }
 0x11d   : > { %v784_v32 = vadd.f32 %v743_v31, %v540_v46  ;;  %v945_v33 = vpop.f32.mrf.mxu1 }
 0x11e   : > { %v2836_v34 = vpop.f32.mrf.mxu0 }
 0x11f   : > { %v986_v35 = vadd.f32 %v945_v33, %v784_v32  ;;  %v2872_v37 = vpop.f32.mrf.mxu1 }
 0x120   : > { %v746_v38 = vpop.f32.mrf.mxu0 }
 0x121   : > { %v785_v39 = vadd.f32 %v746_v38, %v541_v1  ;;  %v948_v40 = vpop.f32.mrf.mxu1 }
 0x122   : > { %v2837_v36 = vpop.f32.mrf.mxu0 }
 0x123   : > { %v987_v42 = vadd.f32 %v948_v40, %v785_v39  ;;  %v2873_v43 = vpop.f32.mrf.mxu1 }
 0x124   : > { %v751_v44 = vpop.f32.mrf.mxu0 }
 0x125   : > { %v786_v45 = vadd.f32 %v751_v44, %v542_v55  ;;  %v953_v47 = vpop.f32.mrf.mxu1 }
 0x126   : > { %v2840_v41 = vpop.f32.mrf.mxu0 }
 0x127   : > { %v988_v48 = vadd.f32 %v953_v47, %v786_v45  ;;  %v2876_v49 = vpop.f32.mrf.mxu1 }
 0x128   : > { %v754_v50 = vpop.f32.mrf.mxu0 }
 0x129   : > { %v787_v51 = vadd.f32 %v754_v50, %v543_v60  ;;  %v956_v52 = vpop.f32.mrf.mxu1 }
 0x12a   : > { %v2841_v46 = vpop.f32.mrf.mxu0 }
 0x12b   : > { %v989_v53 = vadd.f32 %v956_v52, %v787_v51  ;;  %v2877_v54 = vpop.f32.mrf.mxu1 }
 0x12c   : > { %v759_v56 = vpop.f32.mrf.mxu0 }
 0x12d   : > { %v788_v57 = vadd.f32 %v759_v56, %v544_v2  ;;  %v961_v58 = vpop.f32.mrf.mxu1 }
 0x12e   : > { %v2844_v1 = vpop.f32.mrf.mxu0 }
 0x12f   : > { %v3704_v59 = vadd.f32 %v961_v58, %v788_v57  ;;  %v2880_v61 = vpop.f32.mrf.mxu1 }
 0x130   : > { %v762_v62 = vpop.f32.mrf.mxu0 }
 0x131   : > { %v789_v63 = vadd.f32 %v762_v62, %v545_v7  ;;  %v964_v55 = vpop.f32.mrf.mxu1 }
 0x132   : > { %v2845_v0 = vpop.f32.mrf.mxu0 }
 0x133   : > { %v3706_v3 = vadd.f32 %v964_v55, %v789_v63  ;;  %v2881_v4 = vpop.f32.mrf.mxu1 }
 0x134   : > { %v767_v5 = vpop.f32.mrf.mxu0 }
 0x135   : > { %v790_v60 = vadd.f32 %v767_v5, %v546_v12  ;;  %v969_v6 = vpop.f32.mrf.mxu1 }
 0x136   : > { %v2848_v8 = vpop.f32.mrf.mxu0 }
 0x137   : > { %v3708_v9 = vadd.f32 %v969_v6, %v790_v60  ;;  %v2884_v10 = vpop.f32.mrf.mxu1 }
 0x138   : > { %v770_v2 = vpop.f32.mrf.mxu0 }
 0x139   : > { %v972_v11 = vpop.f32.mrf.mxu1 }
 0x13a   : > { %v2849_v13 = vpop.f32.mrf.mxu0 }
 0x13b   : > { %v2885_v14 = vpop.f32.mrf.mxu1 }
 0x13c   : > { %v1139_v15 = vpop.f32.mrf.mxu0 }
 0x13d   : > { %v1186_v16 = vadd.f32 %v1139_v15, %v984_v23  ;;  %v1382_v17 = vpop.f32.mrf.mxu1 }
 0x13e   : > { %v2904_v7 = vpop.f32.mrf.mxu0 }
 0x13f   : > { %v3710_v18 = vadd.f32 %v1382_v17, %v1186_v16  ;;  %v2940_v19 = vpop.f32.mrf.mxu1 }
 0x140   : > { %v1142_v20 = vpop.f32.mrf.mxu0 }
 0x141   : > { %v1187_v21 = vadd.f32 %v1142_v20, %v985_v29  ;;  %v1385_v22 = vpop.f32.mrf.mxu1 }
 0x142   : > { %v2905_v12 = vpop.f32.mrf.mxu0 }
 0x143   : > { %v3712_v24 = vadd.f32 %v1385_v22, %v1187_v21  ;;  %v2941_v25 = vpop.f32.mrf.mxu1 }
 0x144   : > { %v1147_v26 = vpop.f32.mrf.mxu0 }
 0x145   : > { %v1188_v27 = vadd.f32 %v1147_v26, %v986_v35  ;;  %v1390_v28 = vpop.f32.mrf.mxu1 }
 0x146   : > { %v2908_v30 = vpop.f32.mrf.mxu0 }
 0x147   : > { %v3714_v31 = vadd.f32 %v1390_v28, %v1188_v27  ;;  %v2944_v32 = vpop.f32.mrf.mxu1 }
 0x148   : > { %v1150_v23 = vpop.f32.mrf.mxu0 }
 0x149   : > { %v1189_v33 = vadd.f32 %v1150_v23, %v987_v42  ;;  %v1393_v34 = vpop.f32.mrf.mxu1 }
 0x14a   : > { %v2909_v37 = vpop.f32.mrf.mxu0 }
 0x14b   : > { %v3716_v38 = vadd.f32 %v1393_v34, %v1189_v33  ;;  %v2945_v39 = vpop.f32.mrf.mxu1 }
 0x14c   : > { %v1155_v29 = vpop.f32.mrf.mxu0 }
 0x14d   : > { %v1190_v40 = vadd.f32 %v1155_v29, %v988_v48  ;;  %v1398_v36 = vpop.f32.mrf.mxu1 }
 0x14e   : > { %v2912_v43 = vpop.f32.mrf.mxu0 }
 0x14f   : > { %v3718_v44 = vadd.f32 %v1398_v36, %v1190_v40  ;;  %v2948_v45 = vpop.f32.mrf.mxu1 }
 0x150   : > { %v1158_v35 = vpop.f32.mrf.mxu0 }
 0x151   : > { %v1191_v47 = vadd.f32 %v1158_v35, %v989_v53  ;;  %v1401_v41 = vpop.f32.mrf.mxu1 }
 0x152   : > { %v2913_v49 = vpop.f32.mrf.mxu0 }
 0x153   : > { %v3720_v50 = vadd.f32 %v1401_v41, %v1191_v47  ;;  %v2949_v51 = vpop.f32.mrf.mxu1 }
 0x154   : > { %v1163_v42 = vpop.f32.mrf.mxu0 }
 0x155   : > { %v1406_v52 = vpop.f32.mrf.mxu1  ;;  %v1192_v40 = vadd.f32 %v1163_v42, %v3704_v59 }
 0x156   : > { %v2916_v46 = vpop.f32.mrf.mxu0 }
 0x157   : > { %v2952_v54 = vpop.f32.mrf.mxu1  ;;  %v1435_v47 = vadd.f32 %v1406_v52, %v1192_v40 }
 0x158   : > { %v1166_v56 = vpop.f32.mrf.mxu0 }
 0x159   : > { %v1409_v57 = vpop.f32.mrf.mxu1  ;;  %v1193_v41 = vadd.f32 %v1166_v56, %v3706_v3 }
 0x15a   : > { %v2917_v58 = vpop.f32.mrf.mxu0 }
 0x15b   : > { %v2953_v48 = vpop.f32.mrf.mxu1 }
 0x15c   : > { %v1171_v1 = vpop.f32.mrf.mxu0 }
 0x15d   : > { %v1414_v61 = vpop.f32.mrf.mxu1 }
 0x15e   : > { %v2920_v62 = vpop.f32.mrf.mxu0 }
 0x15f   : > { %v2956_v63 = vpop.f32.mrf.mxu1  ;;  %v1436_v62 = vadd.f32 %v1409_v57, %v1193_v41 }
 0x160   : > { %v1174_v55 = vpop.f32.mrf.mxu0  ;;  %v1194_v63 = vadd.f32 %v1171_v1, %v3708_v9 }
 0x161   : > { %v1417_v0 = vpop.f32.mrf.mxu1 }
 0x162   : > { %v2921_v53 = vpop.f32.mrf.mxu0  ;;  %v1437_v56 = vadd.f32 %v1414_v61, %v1194_v63 }
 0x163   : > { %v2957_v4 = vpop.f32.mrf.mxu1 }
 0x164   : > { %v1625_v5 = vpop.f32.mrf.mxu0 }
 0x165   : > { %v1868_v60 = vpop.f32.mrf.mxu1  ;;  %v1672_v51 = vadd.f32 %v1625_v5, %v3710_v18  ;;  %v3740_v18 = vld [vmem:[%s3776_s2] ss:$0 sm:$0xff] }
 0x166   : > { %v2976_v6 = vpop.f32.mrf.mxu0 }
 0x167   : > { %v3012_v8 = vpop.f32.mrf.mxu1  ;;  %v1915_v0 = vadd.f32 %v1868_v60, %v1672_v51 }
 0x168   : > { %v1628_v10 = vpop.f32.mrf.mxu0 }
 0x169   : > { %v1871_v2 = vpop.f32.mrf.mxu1  ;;  %v1673_v59 = vadd.f32 %v1628_v10, %v3712_v24 }
 0x16a   : > { %v2977_v11 = vpop.f32.mrf.mxu0 }
 0x16b   : > { %v3013_v13 = vpop.f32.mrf.mxu1  ;;  %v1916_v9 = vadd.f32 %v1871_v2, %v1673_v59 }
 0x16c   : > { %v1633_v14 = vpop.f32.mrf.mxu0 }
 0x16d   : > { %v1876_v15 = vpop.f32.mrf.mxu1  ;;  %v1674_v1 = vadd.f32 %v1633_v14, %v3714_v31 }
 0x16e   : > { %v2980_v16 = vpop.f32.mrf.mxu0 }
 0x16f   : > { %v3016_v17 = vpop.f32.mrf.mxu1 }
 0x170   : > { %v1636_v7 = vpop.f32.mrf.mxu0 }
 0x171   : > { %v3722_v19 = vpop.f32.mrf.mxu1 }
 0x172   : > { %v2981_v20 = vpop.f32.mrf.mxu0 }
 0x173   : > { %v3017_v21 = vpop.f32.mrf.mxu1 }
 0x174   : > { %v3724_v22 = vpop.f32.mrf.mxu0  ;;  %v1917_v21 = vadd.f32 %v1876_v15, %v1674_v1 }
 0x175   : > { %v3726_v12 = vpop.f32.mrf.mxu1 }
 0x176   : > { %v2984_v25 = vpop.f32.mrf.mxu0 }
 0x177   : > { %v3020_v26 = vpop.f32.mrf.mxu1  ;;  %v1675_v25 = vadd.f32 %v1636_v7, %v3716_v38 }
 0x178   : > { %v3728_v27 = vpop.f32.mrf.mxu0 }
 0x179   : > { %v3730_v28 = vpop.f32.mrf.mxu1 }
 0x17a   : > { %v2985_v30 = vpop.f32.mrf.mxu0 }
 0x17b   : > { %v3021_v32 = vpop.f32.mrf.mxu1 }
 0x17c   : > { %v1649_v23 = vpop.f32.mrf.mxu0 }
 0x17d   : > { %v1892_v33 = vpop.f32.mrf.mxu1  ;;  %v1678_v54 = vadd.f32 %v1649_v23, %v1435_v47 }
 0x17e   : > { %v2988_v34 = vpop.f32.mrf.mxu0 }
 0x17f   : > { %v3024_v37 = vpop.f32.mrf.mxu1  ;;  %v1921_v53 = vadd.f32 %v1892_v33, %v1678_v54 }
 0x180   : > { %v1652_v39 = vpop.f32.mrf.mxu0 }
 0x181   : > { %v1895_v29 = vpop.f32.mrf.mxu1  ;;  %v1679_v4 = vadd.f32 %v1652_v39, %v1436_v62  ;;  %v1918_v39 = vadd.f32 %v3722_v19, %v1675_v25 }
 0x182   : > { %v2989_v36 = vpop.f32.mrf.mxu0 }
 0x183   : > { %v3025_v43 = vpop.f32.mrf.mxu1  ;;  %v1922_v24 = vadd.f32 %v1895_v29, %v1679_v4  ;;  %v1676_v29 = vadd.f32 %v3724_v22, %v3718_v44  ;;  %v1677_v44 = vadd.f32 %v3728_v27, %v3720_v50 }
 0x184   : > { %v1657_v45 = vpop.f32.mrf.mxu0 }
 0x185   : > { %v1900_v35 = vpop.f32.mrf.mxu1  ;;  %v1680_v8 = vadd.f32 %v1657_v45, %v1437_v56  ;;  %v1919_v19 = vadd.f32 %v3726_v12, %v1676_v29  ;;  %v1920_v59 = vadd.f32 %v3730_v28, %v1677_v44 }
 0x186   : > { %v2992_v49 = vpop.f32.mrf.mxu0 }
 0x187   : > { %v3028_v46 = vpop.f32.mrf.mxu1  ;;  %v1923_v31 = vadd.f32 %v1900_v35, %v1680_v8 }
 0x188   : > { %v1660_v58 = vpop.f32.mrf.mxu0 }
 0x189   : > { %v1903_v48 = vpop.f32.mrf.mxu1 }
 0x18a   : > { %v2993_v55 = vpop.f32.mrf.mxu0 }
 0x18b   : > { %v3029_v42 = vpop.f32.mrf.mxu1 }
 0x18c   : > { %v2082_v52 = vpop.f32.mrf.mxu0 }
 0x18d   : > { %v2129_v6 = vadd.f32 %v2082_v52, %v1915_v0  ;;  %v2106_v3 = vpop.f32.mrf.mxu1 }
 0x18e   : > { %v2135_v57 = vadd.f32 %v2106_v3, %v1921_v53  ;;  %v3048_v5 = vpop.f32.mrf.mxu0 }
 0x18f   : > { %v3060_v60 = vpop.f32.mrf.mxu1  ;;  %v2163_v11 = vadd.f32 %v3740_v18, %v2129_v6 }
 0x190   : > { %v2085_v10 = vpop.f32.mrf.mxu0  ;;  %v2169_v61 = vadd.f32 %v3740_v18, %v2135_v57 }
 0x191   : > { %v2130_v13 = vadd.f32 %v2085_v10, %v1916_v9  ;;  %v2109_v16 = vpop.f32.mrf.mxu1  ;;  %v2172_v32 = vmax.f32 %v2163_v11, 0.0 }
 0x192   : > { %v2136_v17 = vadd.f32 %v2109_v16, %v1922_v24  ;;  %v3049_v20 = vpop.f32.mrf.mxu0  ;;  %v2178_v37 = vmax.f32 %v2169_v61, 0.0 }
 0x193   : > { %v2164_v2 = vadd.f32 %v3740_v18, %v2130_v13  ;;  %v3061_v26 = vpop.f32.mrf.mxu1 }
 0x194   : > { %v2170_v14 = vadd.f32 %v3740_v18, %v2136_v17  ;;  %v2090_v30 = vpop.f32.mrf.mxu0 }
 0x195   : > { %v2173_v23 = vmax.f32 %v2164_v2, 0.0  ;;  %v2131_v33 = vadd.f32 %v2090_v30, %v1917_v21  ;;  %v2114_v34 = vpop.f32.mrf.mxu1 }
 0x196   : > { %v2179_v38 = vmax.f32 %v2170_v14, 0.0  ;;  %v2137_v15 = vadd.f32 %v2114_v34, %v1923_v31  ;;  %v3052_v7 = vpop.f32.mrf.mxu0 }
 0x197   : > { %v2605_v40 = vpack.c.bf16 %v2173_v23, %v2172_v32  ;;  %v3064_v36 = vpop.f32.mrf.mxu1  ;;  %v2165_v47 = vadd.f32 %v3740_v18, %v2131_v33 }
 0x198   : > { %v2620_v43 = vpack.c.bf16 %v2179_v38, %v2178_v37  ;;  %v2171_v45 = vadd.f32 %v3740_v18, %v2137_v15  ;;  %v2093_v35 = vpop.f32.mrf.mxu0 }
 0x199   : > { %2606 = vst [vmem:[%s3752_s13] sm:$0xff] %v2605_v40   ;;  %v2132_v41 = vadd.f32 %v2093_v35, %v1918_v39  ;;  %v2117_v49 = vpop.f32.mrf.mxu1  ;;  %v2174_v62 = vmax.f32 %v2165_v47, 0.0 }
 0x19a   : > { %2624 = vst [vmem:[%s3752_s13 + $0x18] sm:$0xff] %v2620_v43   ;;  %v2180_v51 = vmax.f32 %v2171_v45, 0.0  ;;  %v3053_v46 = vpop.f32.mrf.mxu0 }
 0x19b   : > { %v2166_v22 = vadd.f32 %v3740_v18, %v2132_v41  ;;  %v3065_v54 = vpop.f32.mrf.mxu1 }
 0x19c   : > { %v2601_v58 = vpack.c.bf16 %v2180_v51, %v2180_v51  ;;  %v2098_v48 = vpop.f32.mrf.mxu0 }
 0x19d   : > { %v2175_v63 = vmax.f32 %v2166_v22, 0.0  ;;  %v2133_v55 = vadd.f32 %v2098_v48, %v1919_v19 }
 0x19e   : > { %2226 = vst [vmem:[%s3752_s13 + $0x20] sm:$0xf] %v2601_v58  ;;  %v3056_v0 = vpop.f32.mrf.mxu0 }
 0x19f   : > { %v2610_v42 = vpack.c.bf16 %v2175_v63, %v2174_v62  ;;  %v2167_v12 = vadd.f32 %v3740_v18, %v2133_v55 }
 0x1a0   : > { %v2101_v53 = vpop.f32.mrf.mxu0 }
 0x1a1   : > { %2622 = vst [vmem:[%s3752_s13 + $0x8] sm:$0xff] %v2610_v42   ;;  %v2134_v4 = vadd.f32 %v2101_v53, %v1920_v59  ;;  %v2176_v52 = vmax.f32 %v2167_v12, 0.0 }
 0x1a2   : > { %v3057_v50 = vpop.f32.mrf.mxu0 }
 0x1a3   : > { %v2168_v27 = vadd.f32 %v3740_v18, %v2134_v4 }
 0x1a5   : > { %v2177_v6 = vmax.f32 %v2168_v27, 0.0 }
 0x1a7   : > { %v2615_v3 = vpack.c.bf16 %v2177_v6, %v2176_v52 }
 0x1a9   : > { %2623 = vst [vmem:[%s3752_s13 + $0x10] sm:$0xff] %v2615_v3  }
 0x1aa PF: > { %s13_s12 = sadd.s32 1, %s3217_s12  }
 0x1ab   : > { %p10_p4 = scmp.ge.s32.totalorder %s13_s12, 4  }
 0x1ad   :  { %12 = sbr.rel (!%p10_p4) target bundleno = 1 (0x1), region = 73 }

// kernel: bottleneck_forward.5
= control target key start
LH: loop header
LB: loop body
LE: loop exit
PB: predicated region body
PF: predicated region fallthrough
CT: control target
= control target key end

     0   :  { %s1012_s18 = smov 0   ;;  %s1014_s19 = smov 0   ;;  %s1125_s0 = inlined_call_operand.vmem [shape: bf16[128,128], index: 0, kind: input, shape index: {}]   ;;  %s1126_s1 = inlined_call_operand.vmem [shape: bf16[128,128], index: 1, kind: input, shape index: {}]   ;;  %s1127_s2 = inlined_call_operand.vmem [shape: f32[1,128], index: 2, kind: input, shape index: {}]   ;;  %s1128_s3 = inlined_call_operand.vmem [shape: bf16[128,128], index: 3, kind: input, shape index: {}]   ;;  %s1129_s4 = inlined_call_operand.vmem [shape: bf16[128,128], index: 4, kind: input, shape index: {}]   ;;  %s1130_s5 = inlined_call_operand.vmem [shape: f32[128,128], index: 5, kind: output, shape index: {}]  }
   0x1   :  { %s1016_s20 = smov 0  }
   0x2 LB: > { %s27_s21 = sadd.s32 1, %s976_s19  ;;  %p804_p0 = scmp.ge.s32.totalorder %s980_s20, 1  ;;  %s980_s20 = sphi %s1016_s20, %s15_s20   ;;  %s976_s19 = sphi %s1014_s19, %s1132_s19   ;;  %s972_s18 = sphi %s1012_s18, %s1131_s18  }
   0x3   : > { %p29_p1 = scmp.ge.s32.totalorder %s27_s21, 2  ;;  %p227_p2 = scmp.lt.s32.totalorder %s980_s20, 3 }
   0x5   : > { %s1134_s21 = smov (%p29_p1, %s27_s21), 0  ;;  %p228_p3 = pnand %p804_p0, %p227_p2 }
   0x6   : > { %s805_s24 = sshll.u32 (!%p228_p3), %s972_s18, 3 }
   0x7   : > { %231 = sbr.rel (%p228_p3) target bundleno = 259 (0x103), region = 40  ;;  %p269_p4 = scmp.lt.s32.totalorder (!%p228_p3), %s805_s24, 15 }
   0xc   : > { %v934_v0 = vld [vmem:[%s1126_s1 + $0x38] sm:$0xff]   ;;  %v936_v2 = vld [vmem:[%s1126_s1 + $0x30] sm:$0xff]   ;;  %v938_v4 = vld [vmem:[%s1126_s1 + $0x28] sm:$0xff]   ;;  %s1136_s24 = smov (!%p269_p4, %s805_s24), 15 }
   0xd   : > { %v935_v1 = vld [vmem:[%s1129_s4 + $0x38] sm:$0xff]   ;;  %862 = vmatprep.subr.bf16.mxu0 %v934_v0  ;;  %v937_v3 = vld [vmem:[%s1129_s4 + $0x30] sm:$0xff]   ;;  %v939_v5 = vld [vmem:[%s1129_s4 + $0x28] sm:$0xff]   ;;  %s806_s14 = sshll.u32 %s1136_s24, 2  ;;  %s810_s18 = sshll.u32 %s1136_s24, 3 }
   0xe   : > { %886 = vmatprep.subr.bf16.mxu1 %v935_v1  ;;  %863 = vmatpush3.bf16.msra.mxu0 %v934_v0  ;;  %v940_v6 = vld [vmem:[%s1126_s1 + $0x20] sm:$0xff]   ;;  %v942_v8 = vld [vmem:[%s1126_s1 + $0x18] sm:$0xff]   ;;  %s1066_s25 = scalar_lea.vmem %s1125_s0, %s806_s14  ;;  %v944_v10 = vld [vmem:[%s1126_s1 + $0x10] sm:$0xff]   ;;  %s1074_s30 = scalar_lea.vmem %s1128_s3, %s806_s14 }
   0xf   : > { %887 = vmatpush3.bf16.msra.mxu1 %v935_v1  ;;  %864 = vmatprep.subr.bf16.mxu0 %v936_v2  ;;  %v941_v7 = vld [vmem:[%s1129_s4 + $0x20] sm:$0xff]   ;;  %v943_v9 = vld [vmem:[%s1129_s4 + $0x18] sm:$0xff]   ;;  %v945_v11 = vld [vmem:[%s1129_s4 + $0x10] sm:$0xff]   ;;  %s1106_s26 = scalar_lea.vmem %s1130_s5, %s810_s18 }
  0x10   : > { %888 = vmatprep.subr.bf16.mxu1 %v937_v3  ;;  %v950_v12 = vld [vmem:[%s1066_s25] sm:$0xff]   ;;  %v946_v14 = vld [vmem:[%s1126_s1 + $0x8] sm:$0xff]   ;;  %v954_v20 = vld [vmem:[%s1066_s25 + $0x10] sm:$0xff]  }
  0x11   : > { %v951_v13 = vld [vmem:[%s1074_s30] sm:$0xff]   ;;  %878 = vmatprep.mubr.bf16.mxu0 %v950_v12  ;;  %v947_v15 = vld [vmem:[%s1129_s4 + $0x8] sm:$0xff]   ;;  %v955_v21 = vld [vmem:[%s1074_s30 + $0x10] sm:$0xff]  }
  0x12   : > { %865 = vmatpush3.bf16.msra.mxu0 %v936_v2  ;;  %902 = vmatprep.mubr.bf16.mxu1 %v951_v13  ;;  %v948_v16 = vld [vmem:[%s1126_s1] sm:$0xff]   ;;  %v952_v18 = vld [vmem:[%s1066_s25 + $0x8] sm:$0xff]   ;;  %v956_v22 = vld [vmem:[%s1066_s25 + $0x18] sm:$0xff]  }
  0x13   : > { %889 = vmatpush3.bf16.msra.mxu1 %v937_v3  ;;  %866 = vmatprep.subr.bf16.mxu0 %v938_v4  ;;  %v949_v17 = vld [vmem:[%s1129_s4] sm:$0xff]   ;;  %v953_v19 = vld [vmem:[%s1074_s30 + $0x8] sm:$0xff]   ;;  %v957_v23 = vld [vmem:[%s1074_s30 + $0x18] sm:$0xff]  }
  0x14   : > { %890 = vmatprep.subr.bf16.mxu1 %v939_v5  ;;  %v823_v24 = vld [vmem:[%s1127_s2] ss:$0 sm:$0xff] }
  0x16   : > { %867 = vmatpush3.bf16.msra.mxu0 %v938_v4 }
  0x17   : > { %891 = vmatpush3.bf16.msra.mxu1 %v939_v5  ;;  %868 = vmatprep.subr.bf16.mxu0 %v940_v6 }
  0x18   : > { %892 = vmatprep.subr.bf16.mxu1 %v941_v7 }
  0x1a   : > { %869 = vmatpush3.bf16.msra.mxu0 %v940_v6 }
  0x1b   : > { %893 = vmatpush3.bf16.msra.mxu1 %v941_v7  ;;  %870 = vmatprep.subr.bf16.mxu0 %v942_v8 }
  0x1c   : > { %894 = vmatprep.subr.bf16.mxu1 %v943_v9 }
  0x1e   : > { %871 = vmatpush3.bf16.msra.mxu0 %v942_v8 }
  0x1f   : > { %895 = vmatpush3.bf16.msra.mxu1 %v943_v9  ;;  %872 = vmatprep.subr.bf16.mxu0 %v944_v10 }
  0x20   : > { %896 = vmatprep.subr.bf16.mxu1 %v945_v11 }
  0x22   : > { %873 = vmatpush3.bf16.msra.mxu0 %v944_v10 }
  0x23   : > { %897 = vmatpush3.bf16.msra.mxu1 %v945_v11  ;;  %874 = vmatprep.subr.bf16.mxu0 %v946_v14 }
  0x24   : > { %898 = vmatprep.subr.bf16.mxu1 %v947_v15 }
  0x26   : > { %875 = vmatpush3.bf16.msra.mxu0 %v946_v14 }
  0x27   : > { %899 = vmatpush3.bf16.msra.mxu1 %v947_v15  ;;  %876 = vmatprep.subr.bf16.mxu0 %v948_v16 }
  0x28   : > { %900 = vmatprep.subr.bf16.mxu1 %v949_v17 }
  0x2a   : > { %877 = vmatpush3.bf16.msra.mxu0 %v948_v16 }
  0x2b   : > { %901 = vmatpush3.bf16.msra.mxu1 %v949_v17 }
  0x2d   : > { %879 = vmatmul.mubr.bf16.vlgmr.msra.gmra.mxu0 %v952_v18 }
  0x2e   : > { %903 = vmatmul.mubr.bf16.vlgmr.msra.gmra.mxu1 %v953_v19  ;;  %882 = vmatprep.mubr.bf16.mxu0 %v954_v20 }
  0x2f   : > { %906 = vmatprep.mubr.bf16.mxu1 %v955_v21 }
  0x35   : > { %883 = vmatmul.mubr.bf16.gmra.mxu0 %v956_v22 }
  0x36   : > { %907 = vmatmul.mubr.bf16.gmra.mxu1 %v957_v23 }
  0xed   : > { %v880_v25 = vpop.f32.mrf.mxu0 }
  0xee   : > { %v513_v26 = vadd.f32 %v880_v25, %v823_v24  ;;  %v904_v27 = vpop.f32.mrf.mxu1 }
  0xef   : > { %v446_v28 = vpop.f32.mrf.mxu0 }
  0xf0   : > { %v682_v29 = vadd.f32 %v904_v27, %v513_v26  ;;  %v511_v30 = vadd.f32 %v823_v24, %v446_v28  ;;  %v649_v31 = vpop.f32.mrf.mxu1 }
  0xf1   : > { %v881_v32 = vpop.f32.mrf.mxu0 }
  0xf2   : > { %v690_v33 = vmax.f32 %v682_v29, 0.0  ;;  %v680_v34 = vadd.f32 %v649_v31, %v511_v30  ;;  %v514_v35 = vadd.f32 %v881_v32, %v823_v24  ;;  %v905_v36 = vpop.f32.mrf.mxu1 }
  0xf3   : > { %v449_v37 = vpop.f32.mrf.mxu0 }
  0xf4   : > { %698 = vst [vmem:[%s1106_s26 + $0x10] sm:$0xff] %v690_v33  ;;  %v688_v38 = vmax.f32 %v680_v34, 0.0  ;;  %v683_v39 = vadd.f32 %v905_v36, %v514_v35  ;;  %v512_v40 = vadd.f32 %v823_v24, %v449_v37  ;;  %v652_v41 = vpop.f32.mrf.mxu1 }
  0xf5   : > { %v884_v42 = vpop.f32.mrf.mxu0 }
  0xf6   : > { %696 = vst [vmem:[%s1106_s26] sm:$0xff] %v688_v38  ;;  %v691_v43 = vmax.f32 %v683_v39, 0.0  ;;  %v681_v44 = vadd.f32 %v652_v41, %v512_v40  ;;  %v517_v45 = vadd.f32 %v884_v42, %v823_v24  ;;  %v908_v46 = vpop.f32.mrf.mxu1 }
  0xf7   : > { %v462_v47 = vpop.f32.mrf.mxu0 }
  0xf8   : > { %699 = vst [vmem:[%s1106_s26 + $0x18] sm:$0xff] %v691_v43  ;;  %v689_v48 = vmax.f32 %v681_v44, 0.0  ;;  %v686_v49 = vadd.f32 %v908_v46, %v517_v45  ;;  %v515_v50 = vadd.f32 %v823_v24, %v462_v47  ;;  %v665_v51 = vpop.f32.mrf.mxu1 }
  0xf9   : > { %v885_v52 = vpop.f32.mrf.mxu0 }
  0xfa   : > { %697 = vst [vmem:[%s1106_s26 + $0x8] sm:$0xff] %v689_v48  ;;  %v694_v53 = vmax.f32 %v686_v49, 0.0  ;;  %v684_v54 = vadd.f32 %v665_v51, %v515_v50  ;;  %v518_v55 = vadd.f32 %v885_v52, %v823_v24  ;;  %v909_v56 = vpop.f32.mrf.mxu1 }
  0xfb   : > { %v465_v57 = vpop.f32.mrf.mxu0 }
  0xfc   : > { %702 = vst [vmem:[%s1106_s26 + $0x30] sm:$0xff] %v694_v53  ;;  %v692_v58 = vmax.f32 %v684_v54, 0.0  ;;  %v687_v59 = vadd.f32 %v909_v56, %v518_v55  ;;  %v516_v60 = vadd.f32 %v823_v24, %v465_v57  ;;  %v668_v61 = vpop.f32.mrf.mxu1 }
  0xfe   : > { %700 = vst [vmem:[%s1106_s26 + $0x20] sm:$0xff] %v692_v58  ;;  %v695_v62 = vmax.f32 %v687_v59, 0.0  ;;  %v685_v63 = vadd.f32 %v668_v61, %v516_v60 }
 0x100   : > { %703 = vst [vmem:[%s1106_s26 + $0x38] sm:$0xff] %v695_v62  ;;  %v693_v0 = vmax.f32 %v685_v63, 0.0 }
 0x102   : > { %701 = vst [vmem:[%s1106_s26 + $0x28] sm:$0xff] %v693_v0 }
 0x103 PF: > { %s15_s20 = sadd.s32 1, %s980_s20   ;;  %s1131_s18 = smov %s976_s19 }
 0x104   : > { %p12_p5 = scmp.ge.s32.totalorder %s15_s20, 4   ;;  %s1132_s19 = smov %s1134_s21 }
 0x106   :  { %14 = sbr.rel (!%p12_p5) target bundleno = 2 (0x2), region = 84 }

</bundles_post_ra>
